<compile_context>
chip_gen: v7x
topology: tpu7x:2x2x1
jax: 0.10.0
libtpu: 0.0.40
codegen_flags: <defaults>
</compile_context>

<pallas_src>
import math

import jax
import jax.numpy as jnp
import numpy as np
from jax.experimental import pallas as pl
from jax.experimental.pallas import tpu as pltpu

# ----------------------------- configuration --------------------------------
NUM_NODES = 50          # total nodes in memory
N_LOCAL = 16            # |n_id| nodes touched by this batch
E_EDGES = 32            # edges in the sampled subgraph
MEMORY_DIM = 32
NODE_DIM = 0            # CTAN default: no static node features
EDGE_DIM = 8
TIME_DIM = 16
NUM_ITERS = 2           # num_iters of the anti-symmetric ODE
EPSILON = 0.1
GAMMA = 0.1
MEAN_DT = 0.0
STD_DT = 1.0
READOUT_HIDDEN = 32
READOUT_OUT = 1
BATCH = 8
NEG_INF = -1e30
D = MEMORY_DIM + NODE_DIM

# ---- packed parameter slab layout: one (128, 128) f32 slab, one DMA ----
W_COLS = 4 * D                            # 128 lanes (lane-dense)
RW_QKVH = 0                               # rows   0:32   [Wq | Wk | Wv | W_eff]   (D, 4D)
RW_EDGE = RW_QKVH + D                     # rows  32:56   [We_time ; We_msg]       (24, D)
RW_SD = RW_EDGE + TIME_DIM + EDGE_DIM     # rows  56:88   [Ws | Wd]                (D, 2H)
RW_F = RW_SD + D                          # rows  88:120  Wf                       (H, 1)
RW_B = RW_F + READOUT_HIDDEN              # rows 120:123  bias rows
W_ROWS = 128
# bias row RW_B+1 column layout
CB_TW = 0
CB_TB = CB_TW + TIME_DIM
CB_BE = CB_TB + TIME_DIM
CB_BS = CB_BE + D
CB_BD = CB_BS + READOUT_HIDDEN
assert RW_B + 3 <= W_ROWS and CB_BD + READOUT_HIDDEN <= W_COLS

# ---- packed data slab layout: one (152, 32) f32 slab, one DMA ----
DATA_COLS = D
RD_X = 0                                  # rows   0:16   node features x          (N, D)
RD_E = RD_X + N_LOCAL                     # rows  16:48   [rel_t | msg | pad]      (E, 32)
RD_GS = RD_E + E_EDGES                    # rows  48:80   one-hot src gather       (E, N)
RD_GD = RD_GS + E_EDGES                   # rows  80:112  one-hot dst gather       (E, N)
RD_M = RD_GD + E_EDGES                    # rows 112:128  incidence mask (dst)^T   (N, E)
RD_RO = RD_M + N_LOCAL                    # rows 128:152  readout gather [s;p;n]   (3B, N)
DATA_ROWS = RD_RO + 3 * BATCH
assert DATA_ROWS % 8 == 0

OUT_COLS = 4 * D                          # (BATCH, 128): [z_src | z_pos | pos | neg]


# ------------------------------ Pallas kernel --------------------------------
def ctan_fused_kernel(data_ref, w_ref, out_ref):
    f32 = jnp.float32
    scale = 1.0 / math.sqrt(D)

    # ---- packed parameters (static slab views) ----
    w_all = w_ref[RW_QKVH:RW_QKVH + D, :]                               # (D, 4D)
    we_t = w_ref[RW_EDGE:RW_EDGE + TIME_DIM, 0:D]                       # (16, D)
    we_m = w_ref[RW_EDGE + TIME_DIM:RW_EDGE + TIME_DIM + EDGE_DIM, 0:D]  # (8, D)
    w_sd = w_ref[RW_SD:RW_SD + D, 0:2 * READOUT_HIDDEN]                 # (D, 2H)
    w_f = w_ref[RW_F:RW_F + READOUT_HIDDEN, 0:READOUT_OUT]              # (H, 1)
    btile = w_ref[RW_B:RW_B + 8, :]                                     # (8, 128)
    b_all = btile[0:1, :]                                               # (1, 4D)
    tw = btile[1:2, CB_TW:CB_TW + TIME_DIM]                             # (1, 16)
    tb = btile[1:2, CB_TB:CB_TB + TIME_DIM]                             # (1, 16)
    be = btile[1:2, CB_BE:CB_BE + D]                                    # (1, D)
    bs = btile[1:2, CB_BS:CB_BS + READOUT_HIDDEN]                       # (1, H)
    bd = btile[1:2, CB_BD:CB_BD + READOUT_HIDDEN]                       # (1, H)
    bf = btile[2:3, 0:READOUT_OUT]                                      # (1, 1)

    # ---- packed per-batch data (static slab views) ----
    x = data_ref[RD_X:RD_X + N_LOCAL, :]                                # (N, D)
    eblk = data_ref[RD_E:RD_E + E_EDGES, :]                             # (E, 32)
    rel_t = eblk[:, 0:1]                                                # (E, 1)
    msg = eblk[:, 1:1 + EDGE_DIM]                                       # (E, 8)
    gsrc = data_ref[RD_GS:RD_GS + E_EDGES, 0:N_LOCAL]                   # (E, N)
    gdst = data_ref[RD_GD:RD_GD + E_EDGES, 0:N_LOCAL]                   # (E, N)
    mask = data_ref[RD_M:RD_M + N_LOCAL, :] > 0.0                       # (N, E) pre-transposed
    gro = data_ref[RD_RO:RD_RO + 3 * BATCH, 0:N_LOCAL]                  # (3B, N)

    # time encoding: rank-1 -> VPU broadcast multiply (no K=1 MXU matmul)
    rel_enc = jnp.cos(rel_t * tw + tb)                                  # (E, TIME_DIM)
    # edge projection (lin_edge on concat([rel_t_enc, msg]))
    ek = (jnp.dot(rel_enc, we_t, preferred_element_type=f32)
          + jnp.dot(msg, we_m, preferred_element_type=f32) + be)        # (E, D)

    for _ in range(NUM_ITERS):
        # single lane-dense fused projection: [q | k | v | x@W_eff+b]
        qkvh = jnp.dot(x, w_all, preferred_element_type=f32) + b_all    # (N, 4D)
        q = qkvh[:, 0:D]
        kv = qkvh[:, D:3 * D]                                           # (N, 2D) [k | v]
        hlin = qkvh[:, 3 * D:4 * D]                                     # (N, D)

        # fused edge gathers
        q_dst = jnp.dot(gdst, q, preferred_element_type=f32)            # (E, D)
        kv_src = jnp.dot(gsrc, kv, preferred_element_type=f32)          # (E, 2D)
        k_src = kv_src[:, 0:D]
        v_src = kv_src[:, D:2 * D]

        # per-edge attention logits + segment softmax over edges sharing a dst
        s = jnp.sum(q_dst * (k_src + ek), axis=-1, keepdims=True) * scale   # (E, 1)
        logits = jnp.where(mask, s.T, NEG_INF)                          # (N, E)
        m = jnp.max(logits, axis=-1, keepdims=True)
        p = jnp.where(mask, jnp.exp(logits - m), 0.0)
        alpha = p / jnp.maximum(jnp.sum(p, axis=-1, keepdims=True), 1e-16)
        conv = jnp.dot(alpha, v_src + ek, preferred_element_type=f32)   # (N, D)

        # anti-symmetric ODE step: x <- x + eps * tanh(x (W - W^T - gI)^T + b + conv)
        x = x + EPSILON * jnp.tanh(hlin + conv)

    # fused LinkPredictor readout on the resident node tile, sharing z_src @ Ws
    zg = jnp.dot(gro, x, preferred_element_type=f32)                    # (3B, D) [z_s; z_p; z_n]
    proj = jnp.dot(zg, w_sd, preferred_element_type=f32)                # (3B, 2H)
    hs = proj[0:BATCH, 0:READOUT_HIDDEN] + bs                           # z_src @ Ws + bs
    hp = proj[BATCH:2 * BATCH, READOUT_HIDDEN:2 * READOUT_HIDDEN] + bd
    hn = proj[2 * BATCH:3 * BATCH, READOUT_HIDDEN:2 * READOUT_HIDDEN] + bd
    h = jnp.maximum(jnp.concatenate([hs + hp, hs + hn], axis=0), 0.0)   # (2B, H)
    logit = jnp.dot(h, w_f, preferred_element_type=f32) + bf            # (2B, 1)

    z_src = zg[0:BATCH, :]
    z_pos = zg[BATCH:2 * BATCH, :]
    pos_b = jnp.broadcast_to(logit[0:BATCH, :], (BATCH, D))
    neg_b = jnp.broadcast_to(logit[BATCH:2 * BATCH, :], (BATCH, D))
    # one lane-dense (BATCH, 128) store: [z_src | z_pos | pos | neg]
    out_ref[...] = jnp.concatenate([z_src, z_pos, pos_b, neg_b], axis=-1)


# ------------------------------ packing helpers -------------------------------
def pack_params(p):
    """Pack all model parameters into one (128, 128) f32 slab (done once)."""
    w = jnp.zeros((W_ROWS, W_COLS), jnp.float32)
    w = w.at[RW_QKVH:RW_QKVH + D, :].set(
        jnp.concatenate([p["wq"], p["wk"], p["wv"], p["w_eff"]], axis=1))
    w = w.at[RW_EDGE:RW_EDGE + TIME_DIM + EDGE_DIM, 0:D].set(
        jnp.concatenate([p["we_t"], p["we_m"]], axis=0))
    w = w.at[RW_SD:RW_SD + D, 0:2 * READOUT_HIDDEN].set(
        jnp.concatenate([p["ws"], p["wd"]], axis=1))
    w = w.at[RW_F:RW_F + READOUT_HIDDEN, 0:READOUT_OUT].set(p["wf"])
    w = w.at[RW_B, :].set(
        jnp.concatenate([p["bq"], p["bk"], p["bv"], p["b_anti"]], axis=1)[0])
    w = w.at[RW_B + 1, CB_TW:CB_TW + TIME_DIM].set(p["time_w"][0])
    w = w.at[RW_B + 1, CB_TB:CB_TB + TIME_DIM].set(p["time_b"][0])
    w = w.at[RW_B + 1, CB_BE:CB_BE + D].set(p["be"][0])
    w = w.at[RW_B + 1, CB_BS:CB_BS + READOUT_HIDDEN].set(p["bs"][0])
    w = w.at[RW_B + 1, CB_BD:CB_BD + READOUT_HIDDEN].set(p["bf"].dtype.type(0) + p["bd"][0])
    w = w.at[RW_B + 2, 0:READOUT_OUT].set(p["bf"][0])
    return w


def _pad_cols(a, cols):
    return jnp.pad(a, ((0, 0), (0, cols - a.shape[1])))


def pack_data(x, rel_t, msg, gsrc, gdst, maskf, gro):
    """Pack all per-batch tensors into one (152, 32) f32 slab -> one input DMA."""
    edge = jnp.concatenate([rel_t, msg], axis=1)            # (E, 1 + EDGE_DIM)
    return jnp.concatenate([
        x.astype(jnp.float32),
        _pad_cols(edge.astype(jnp.float32), DATA_COLS),
        _pad_cols(gsrc, DATA_COLS),
        _pad_cols(gdst, DATA_COLS),
        maskf,
        _pad_cols(gro, DATA_COLS),
    ], axis=0)


# ------------------------------ forward wrapper -------------------------------
@jax.jit
def ctan_forward(w_slab, memory, last_update, n_id, edge_index, t_edge, msg,
                 src, pos_dst, neg_dst, id_mapper):
    """Full CTAN.forward: sparse-graph glue (gathers / one-hot) in plain JAX,
    the whole hot path (time enc, attention conv, ODE iterations, readout) in
    ONE fused Pallas kernel."""
    x = memory[n_id]                                                 # (N, D)
    lu = last_update[n_id]                                           # (N,)

    rel_t = ((lu[edge_index[0]] - t_edge - MEAN_DT) / STD_DT).reshape(E_EDGES, 1)
    rel_t = rel_t.astype(jnp.float32)

    # sparse graph as dense one-hot gather matrices; mask pre-transposed (N, E)
    gsrc = jax.nn.one_hot(edge_index[0], N_LOCAL, dtype=jnp.float32)   # (E, N)
    gdst = jax.nn.one_hot(edge_index[1], N_LOCAL, dtype=jnp.float32)   # (E, N)
    maskf = gdst.T                                                     # (N, E)

    # readout gather: [src; pos_dst; neg_dst] as one (3B, N) one-hot
    ro_ids = jnp.concatenate([id_mapper[src], id_mapper[pos_dst], id_mapper[neg_dst]])
    gro = jax.nn.one_hot(ro_ids, N_LOCAL, dtype=jnp.float32)           # (3B, N)

    data = pack_data(x, rel_t, msg, gsrc, gdst, maskf, gro)            # (152, 32)

    packed = pl.pallas_call(
        ctan_fused_kernel,
        out_shape=jax.ShapeDtypeStruct((BATCH, OUT_COLS), jnp.float32),
        in_specs=[pl.BlockSpec(memory_space=pltpu.MemorySpace.VMEM),
                  pl.BlockSpec(memory_space=pltpu.MemorySpace.VMEM)],
        out_specs=pl.BlockSpec(memory_space=pltpu.MemorySpace.VMEM),
    )(data, w_slab)

    # TODO(synk): final_act is None in this configuration; apply here if configured.
    z_src = packed[:, 0:D]
    z_pos = packed[:, D:2 * D]
    pos_out = packed[:, 2 * D:2 * D + 1]
    neg_out = packed[:, 3 * D:3 * D + 1]
    return pos_out, neg_out, z_src, z_pos


# --------------------------- pure-JAX reference ------------------------------
def ctan_forward_ref(params, memory, last_update, n_id, edge_index, t_edge, msg,
                     src, pos_dst, neg_dst, id_mapper):
    p = params
    dot = lambda a, b: jnp.dot(a, b, precision=jax.lax.Precision.HIGHEST)
    x = memory[n_id]
    lu = last_update[n_id]
    rel_t = ((lu[edge_index[0]] - t_edge - MEAN_DT) / STD_DT).reshape(E_EDGES, 1)
    gsrc = jax.nn.one_hot(edge_index[0], N_LOCAL, dtype=jnp.float32)
    gdst = jax.nn.one_hot(edge_index[1], N_LOCAL, dtype=jnp.float32)

    rel_enc = jnp.cos(dot(rel_t, p["time_w"]) + p["time_b"])
    ek = dot(rel_enc, p["we_t"]) + dot(msg, p["we_m"]) + p["be"]
    mask = gdst.T > 0.0
    scale = 1.0 / math.sqrt(D)
    for _ in range(NUM_ITERS):
        q = dot(x, p["wq"]) + p["bq"]
        k = dot(x, p["wk"]) + p["bk"]
        v = dot(x, p["wv"]) + p["bv"]
        q_dst, k_src, v_src = dot(gdst, q), dot(gsrc, k), dot(gsrc, v)
        s = jnp.sum(q_dst * (k_src + ek), axis=-1, keepdims=True) * scale
        logits = jnp.where(mask, s.T, NEG_INF)
        m = jnp.max(logits, axis=-1, keepdims=True)
        pexp = jnp.where(mask, jnp.exp(logits - m), 0.0)
        alpha = pexp / jnp.maximum(jnp.sum(pexp, axis=-1, keepdims=True), 1e-16)
        conv = dot(alpha, v_src + ek)
        h = dot(x, p["w_eff"]) + p["b_anti"] + conv
        x = x + EPSILON * jnp.tanh(h)

    z_src, z_pos, z_neg = x[id_mapper[src]], x[id_mapper[pos_dst]], x[id_mapper[neg_dst]]

    def ro(a, b):
        h = jnp.maximum(dot(a, p["ws"]) + p["bs"] + dot(b, p["wd"]) + p["bd"], 0.0)
        return dot(h, p["wf"]) + p["bf"]

    return ro(z_src, z_pos), ro(z_src, z_neg), z_src, z_pos


# ------------------------------ parameter init -------------------------------
def init_params(key):
    ks = jax.random.split(key, 20)

    def w(k, shape, scale=0.1):
        return (scale * jax.random.normal(k, shape)).astype(jnp.float32)

    w_anti = w(ks[11], (D, D))
    params = {
        # TimeEncoder: Linear(1, time_dim) (stored transposed for x @ W)
        "time_w": w(ks[0], (1, TIME_DIM)),
        "time_b": w(ks[1], (1, TIME_DIM)),
        # TransformerConv (heads=1, root_weight=False, edge_dim=time_dim+edge_dim)
        "wq": w(ks[2], (D, D)), "bq": w(ks[3], (1, D)),
        "wk": w(ks[4], (D, D)), "bk": w(ks[5], (1, D)),
        "wv": w(ks[6], (D, D)), "bv": w(ks[7], (1, D)),
        "we_t": w(ks[8], (TIME_DIM, D)),
        "we_m": w(ks[9], (EDGE_DIM, D)),
        "be": w(ks[10], (1, D)),
        # anti-symmetric update: x @ (W - W^T - gamma*I)^T + b
        "w_eff": (w_anti.T - w_anti - GAMMA * jnp.eye(D, dtype=jnp.float32)),
        "b_anti": w(ks[12], (1, D)),
        # LinkPredictor
        "ws": w(ks[13], (D, READOUT_HIDDEN)), "bs": w(ks[14], (1, READOUT_HIDDEN)),
        "wd": w(ks[15], (D, READOUT_HIDDEN)), "bd": w(ks[16], (1, READOUT_HIDDEN)),
        "wf": w(ks[17], (READOUT_HIDDEN, READOUT_OUT)), "bf": w(ks[18], (1, READOUT_OUT)),
    }
    return params


# ------------------------------------ main ------------------------------------
if __name__ == "__main__":
    key = jax.random.PRNGKey(0)
    kp, k1, k2, k3, k4, k5, k6, k7, k8 = jax.random.split(key, 9)

    params = init_params(kp)
    w_slab = pack_params(params)          # packed once, reused every forward call

    # synthetic memory state
    memory = (0.5 * jax.random.normal(k1, (NUM_NODES, MEMORY_DIM))).astype(jnp.float32)
    last_update = jax.random.uniform(k2, (NUM_NODES,), minval=0.0, maxval=100.0).astype(jnp.float32)

    # sampled subgraph
    n_id = jax.random.permutation(k3, NUM_NODES)[:N_LOCAL]                    # global ids
    edge_index = jax.random.randint(k4, (2, E_EDGES), 0, N_LOCAL)             # local ids
    t_edge = jax.random.uniform(k5, (E_EDGES,), minval=0.0, maxval=100.0).astype(jnp.float32)
    msg = jax.random.normal(k6, (E_EDGES, EDGE_DIM)).astype(jnp.float32)

    # batch of link-prediction queries (global node ids drawn from n_id)
    src = n_id[jax.random.randint(k7, (BATCH,), 0, N_LOCAL)]
    pos_dst = n_id[jax.random.randint(k8, (BATCH,), 0, N_LOCAL)]
    neg_dst = n_id[(jax.random.randint(k8, (BATCH,), 0, N_LOCAL) + 3) % N_LOCAL]

    # id_mapper: global node id -> position in n_id
    id_mapper = jnp.zeros((NUM_NODES,), dtype=jnp.int32).at[n_id].set(
        jnp.arange(N_LOCAL, dtype=jnp.int32))

    pos_out, neg_out, emb_src, emb_dst = ctan_forward(
        w_slab, memory, last_update, n_id, edge_index, t_edge, msg,
        src, pos_dst, neg_dst, id_mapper)
    jax.block_until_ready((pos_out, neg_out, emb_src, emb_dst))

    # verify against a pure-JAX reference of the same (unfused) math
    r_pos, r_neg, r_src, r_dst = ctan_forward_ref(
        params, memory, last_update, n_id, edge_index, t_edge, msg,
        src, pos_dst, neg_dst, id_mapper)

    assert pos_out.shape == (BATCH, READOUT_OUT) and neg_out.shape == (BATCH, READOUT_OUT)
    assert emb_src.shape == (BATCH, D) and emb_dst.shape == (BATCH, D)
    np.testing.assert_allclose(np.asarray(pos_out), np.asarray(r_pos), rtol=1e-3, atol=1e-4)
    np.testing.assert_allclose(np.asarray(neg_out), np.asarray(r_neg), rtol=1e-3, atol=1e-4)
    np.testing.assert_allclose(np.asarray(emb_src), np.asarray(r_src), rtol=1e-3, atol=1e-4)
    np.testing.assert_allclose(np.asarray(emb_dst), np.asarray(r_dst), rtol=1e-3, atol=1e-4)

    print("KERNEL_OK")
</pallas_src>

<mosaic_0001>
module attributes {stable_mosaic.version = 11 : i64} {
  func.func @ctan_fused_kernel(%arg0: memref<152x32xf32, #tpu.memory_space<vmem>>, %arg1: memref<128x128xf32, #tpu.memory_space<vmem>>, %arg2: memref<8x128xf32, #tpu.memory_space<vmem>>) attributes {dimension_semantics = [], scalar_prefetch = 0 : i64, scratch_operands = 0 : i64, tpu.core_type = #tpu.core_type<tc>} {
    %c0 = arith.constant 0 : index
    %c0_0 = arith.constant 0 : index
    %0 = vector.load %arg1[%c0, %c0_0] : memref<128x128xf32, #tpu.memory_space<vmem>>, vector<32x128xf32>
    %c32 = arith.constant 32 : index
    %c0_1 = arith.constant 0 : index
    %1 = vector.load %arg1[%c32, %c0_1] : memref<128x128xf32, #tpu.memory_space<vmem>>, vector<16x32xf32>
    %c48 = arith.constant 48 : index
    %c0_2 = arith.constant 0 : index
    %2 = vector.load %arg1[%c48, %c0_2] : memref<128x128xf32, #tpu.memory_space<vmem>>, vector<8x32xf32>
    %c56 = arith.constant 56 : index
    %c0_3 = arith.constant 0 : index
    %3 = vector.load %arg1[%c56, %c0_3] : memref<128x128xf32, #tpu.memory_space<vmem>>, vector<32x64xf32>
    %c88 = arith.constant 88 : index
    %c0_4 = arith.constant 0 : index
    %4 = vector.load %arg1[%c88, %c0_4] : memref<128x128xf32, #tpu.memory_space<vmem>>, vector<32x1xf32>
    %c120 = arith.constant 120 : index
    %c0_5 = arith.constant 0 : index
    %5 = vector.load %arg1[%c120, %c0_5] : memref<128x128xf32, #tpu.memory_space<vmem>>, vector<8x128xf32>
    %6 = vector.extract_strided_slice %5 {offsets = [0, 0], sizes = [1, 128], strides = [1, 1]} : vector<8x128xf32> to vector<1x128xf32>
    %7 = vector.extract_strided_slice %5 {offsets = [1, 0], sizes = [1, 16], strides = [1, 1]} : vector<8x128xf32> to vector<1x16xf32>
    %8 = vector.extract_strided_slice %5 {offsets = [1, 16], sizes = [1, 16], strides = [1, 1]} : vector<8x128xf32> to vector<1x16xf32>
    %9 = vector.extract_strided_slice %5 {offsets = [1, 32], sizes = [1, 32], strides = [1, 1]} : vector<8x128xf32> to vector<1x32xf32>
    %10 = vector.extract_strided_slice %5 {offsets = [1, 64], sizes = [1, 32], strides = [1, 1]} : vector<8x128xf32> to vector<1x32xf32>
    %11 = vector.extract_strided_slice %5 {offsets = [1, 96], sizes = [1, 32], strides = [1, 1]} : vector<8x128xf32> to vector<1x32xf32>
    %12 = vector.extract_strided_slice %5 {offsets = [2, 0], sizes = [1, 1], strides = [1, 1]} : vector<8x128xf32> to vector<1x1xf32>
    %c0_6 = arith.constant 0 : index
    %c0_7 = arith.constant 0 : index
    %13 = vector.load %arg0[%c0_6, %c0_7] : memref<152x32xf32, #tpu.memory_space<vmem>>, vector<16x32xf32>
    %c16 = arith.constant 16 : index
    %c0_8 = arith.constant 0 : index
    %14 = vector.load %arg0[%c16, %c0_8] : memref<152x32xf32, #tpu.memory_space<vmem>>, vector<32x32xf32>
    %15 = vector.extract_strided_slice %14 {offsets = [0, 0], sizes = [32, 1], strides = [1, 1]} : vector<32x32xf32> to vector<32x1xf32>
    %16 = vector.extract_strided_slice %14 {offsets = [0, 1], sizes = [32, 8], strides = [1, 1]} : vector<32x32xf32> to vector<32x8xf32>
    %c48_9 = arith.constant 48 : index
    %c0_10 = arith.constant 0 : index
    %17 = vector.load %arg0[%c48_9, %c0_10] : memref<152x32xf32, #tpu.memory_space<vmem>>, vector<32x16xf32>
    %c80 = arith.constant 80 : index
    %c0_11 = arith.constant 0 : index
    %18 = vector.load %arg0[%c80, %c0_11] : memref<152x32xf32, #tpu.memory_space<vmem>>, vector<32x16xf32>
    %c112 = arith.constant 112 : index
    %c0_12 = arith.constant 0 : index
    %19 = vector.load %arg0[%c112, %c0_12] : memref<152x32xf32, #tpu.memory_space<vmem>>, vector<16x32xf32>
    %cst = arith.constant 0.000000e+00 : f32
    %20 = vector.broadcast %cst : f32 to vector<16x32xf32>
    %21 = arith.cmpf ogt, %19, %20 : vector<16x32xf32>
    %c128 = arith.constant 128 : index
    %c0_13 = arith.constant 0 : index
    %22 = vector.load %arg0[%c128, %c0_13] : memref<152x32xf32, #tpu.memory_space<vmem>>, vector<24x16xf32>
    %23 = vector.broadcast %15 : vector<32x1xf32> to vector<32x16xf32>
    %24 = vector.broadcast %7 : vector<1x16xf32> to vector<32x16xf32>
    %25 = arith.mulf %23, %24 : vector<32x16xf32>
    %26 = vector.broadcast %8 : vector<1x16xf32> to vector<32x16xf32>
    %27 = arith.addf %25, %26 : vector<32x16xf32>
    %28 = math.cos %27 : vector<32x16xf32>
    %cst_14 = arith.constant dense<0.000000e+00> : vector<32x32xf32>
    %29 = tpu.matmul %28, %1, %cst_14 {dimension_numbers = #tpu.dot_dimension_numbers<[1], [0], [0], [1], [0, 0, 1, 1], [], []>} : vector<32x16xf32>, vector<16x32xf32>, vector<32x32xf32> -> vector<32x32xf32>
    %cst_15 = arith.constant dense<0.000000e+00> : vector<32x32xf32>
    %30 = tpu.matmul %16, %2, %cst_15 {dimension_numbers = #tpu.dot_dimension_numbers<[1], [0], [0], [1], [0, 0, 1, 1], [], []>} : vector<32x8xf32>, vector<8x32xf32>, vector<32x32xf32> -> vector<32x32xf32>
    %31 = arith.addf %29, %30 : vector<32x32xf32>
    %32 = vector.broadcast %9 : vector<1x32xf32> to vector<32x32xf32>
    %33 = arith.addf %31, %32 : vector<32x32xf32>
    %cst_16 = arith.constant dense<0.000000e+00> : vector<16x128xf32>
    %34 = tpu.matmul %13, %0, %cst_16 {dimension_numbers = #tpu.dot_dimension_numbers<[1], [0], [0], [1], [0, 0, 1, 1], [], []>} : vector<16x32xf32>, vector<32x128xf32>, vector<16x128xf32> -> vector<16x128xf32>
    %35 = vector.broadcast %6 : vector<1x128xf32> to vector<16x128xf32>
    %36 = arith.addf %34, %35 : vector<16x128xf32>
    %37 = vector.extract_strided_slice %36 {offsets = [0, 0], sizes = [16, 32], strides = [1, 1]} : vector<16x128xf32> to vector<16x32xf32>
    %38 = vector.extract_strided_slice %36 {offsets = [0, 32], sizes = [16, 64], strides = [1, 1]} : vector<16x128xf32> to vector<16x64xf32>
    %39 = vector.extract_strided_slice %36 {offsets = [0, 96], sizes = [16, 32], strides = [1, 1]} : vector<16x128xf32> to vector<16x32xf32>
    %cst_17 = arith.constant dense<0.000000e+00> : vector<32x32xf32>
    %40 = tpu.matmul %18, %37, %cst_17 {dimension_numbers = #tpu.dot_dimension_numbers<[1], [0], [0], [1], [0, 0, 1, 1], [], []>} : vector<32x16xf32>, vector<16x32xf32>, vector<32x32xf32> -> vector<32x32xf32>
    %cst_18 = arith.constant dense<0.000000e+00> : vector<32x64xf32>
    %41 = tpu.matmul %17, %38, %cst_18 {dimension_numbers = #tpu.dot_dimension_numbers<[1], [0], [0], [1], [0, 0, 1, 1], [], []>} : vector<32x16xf32>, vector<16x64xf32>, vector<32x64xf32> -> vector<32x64xf32>
    %42 = vector.extract_strided_slice %41 {offsets = [0, 0], sizes = [32, 32], strides = [1, 1]} : vector<32x64xf32> to vector<32x32xf32>
    %43 = vector.extract_strided_slice %41 {offsets = [0, 32], sizes = [32, 32], strides = [1, 1]} : vector<32x64xf32> to vector<32x32xf32>
    %44 = arith.addf %42, %33 : vector<32x32xf32>
    %45 = arith.mulf %40, %44 : vector<32x32xf32>
    %cst_19 = arith.constant dense<0.000000e+00> : vector<32xf32>
    %46 = vector.multi_reduction <add>, %45, %cst_19 [1] : vector<32x32xf32> to vector<32xf32>
    %47 = vector.shape_cast %46 : vector<32xf32> to vector<32x1xf32>
    %cst_20 = arith.constant 0.176776692 : f32
    %48 = vector.broadcast %cst_20 : f32 to vector<32x1xf32>
    %49 = arith.mulf %47, %48 : vector<32x1xf32>
    %50 = tpu.transpose %49, [1, 0] : vector<32x1xf32> -> vector<1x32xf32>
    %cst_21 = arith.constant -1.000000e+30 : f32
    %51 = vector.shape_cast %50 : vector<1x32xf32> to vector<1x32xf32>
    %52 = vector.broadcast %51 : vector<1x32xf32> to vector<16x32xf32>
    %53 = vector.broadcast %cst_21 : f32 to vector<16x32xf32>
    %54 = arith.select %21, %52, %53 : vector<16x32xi1>, vector<16x32xf32>
    %cst_22 = arith.constant dense<0xFF800000> : vector<16xf32>
    %55 = vector.multi_reduction <maximumf>, %54, %cst_22 [1] : vector<16x32xf32> to vector<16xf32>
    %56 = vector.shape_cast %55 : vector<16xf32> to vector<16x1xf32>
    %57 = vector.broadcast %56 : vector<16x1xf32> to vector<16x32xf32>
    %58 = arith.subf %54, %57 : vector<16x32xf32>
    %59 = math.exp %58 : vector<16x32xf32>
    %cst_23 = arith.constant 0.000000e+00 : f32
    %60 = vector.broadcast %cst_23 : f32 to vector<16x32xf32>
    %61 = arith.select %21, %59, %60 : vector<16x32xi1>, vector<16x32xf32>
    %cst_24 = arith.constant dense<0.000000e+00> : vector<16xf32>
    %62 = vector.multi_reduction <add>, %61, %cst_24 [1] : vector<16x32xf32> to vector<16xf32>
    %63 = vector.shape_cast %62 : vector<16xf32> to vector<16x1xf32>
    %cst_25 = arith.constant 1.000000e-16 : f32
    %64 = vector.broadcast %cst_25 : f32 to vector<16x1xf32>
    %65 = arith.maximumf %63, %64 : vector<16x1xf32>
    %66 = vector.broadcast %65 : vector<16x1xf32> to vector<16x32xf32>
    %67 = arith.divf %61, %66 : vector<16x32xf32>
    %68 = arith.addf %43, %33 : vector<32x32xf32>
    %cst_26 = arith.constant dense<0.000000e+00> : vector<16x32xf32>
    %69 = tpu.matmul %67, %68, %cst_26 {dimension_numbers = #tpu.dot_dimension_numbers<[1], [0], [0], [1], [0, 0, 1, 1], [], []>} : vector<16x32xf32>, vector<32x32xf32>, vector<16x32xf32> -> vector<16x32xf32>
    %70 = arith.addf %39, %69 : vector<16x32xf32>
    %71 = math.tanh %70 : vector<16x32xf32>
    %cst_27 = arith.constant 1.000000e-01 : f32
    %72 = vector.broadcast %cst_27 : f32 to vector<16x32xf32>
    %73 = arith.mulf %72, %71 : vector<16x32xf32>
    %74 = arith.addf %13, %73 : vector<16x32xf32>
    %cst_28 = arith.constant dense<0.000000e+00> : vector<16x128xf32>
    %75 = tpu.matmul %74, %0, %cst_28 {dimension_numbers = #tpu.dot_dimension_numbers<[1], [0], [0], [1], [0, 0, 1, 1], [], []>} : vector<16x32xf32>, vector<32x128xf32>, vector<16x128xf32> -> vector<16x128xf32>
    %76 = vector.broadcast %6 : vector<1x128xf32> to vector<16x128xf32>
    %77 = arith.addf %75, %76 : vector<16x128xf32>
    %78 = vector.extract_strided_slice %77 {offsets = [0, 0], sizes = [16, 32], strides = [1, 1]} : vector<16x128xf32> to vector<16x32xf32>
    %79 = vector.extract_strided_slice %77 {offsets = [0, 32], sizes = [16, 64], strides = [1, 1]} : vector<16x128xf32> to vector<16x64xf32>
    %80 = vector.extract_strided_slice %77 {offsets = [0, 96], sizes = [16, 32], strides = [1, 1]} : vector<16x128xf32> to vector<16x32xf32>
    %cst_29 = arith.constant dense<0.000000e+00> : vector<32x32xf32>
    %81 = tpu.matmul %18, %78, %cst_29 {dimension_numbers = #tpu.dot_dimension_numbers<[1], [0], [0], [1], [0, 0, 1, 1], [], []>} : vector<32x16xf32>, vector<16x32xf32>, vector<32x32xf32> -> vector<32x32xf32>
    %cst_30 = arith.constant dense<0.000000e+00> : vector<32x64xf32>
    %82 = tpu.matmul %17, %79, %cst_30 {dimension_numbers = #tpu.dot_dimension_numbers<[1], [0], [0], [1], [0, 0, 1, 1], [], []>} : vector<32x16xf32>, vector<16x64xf32>, vector<32x64xf32> -> vector<32x64xf32>
    %83 = vector.extract_strided_slice %82 {offsets = [0, 0], sizes = [32, 32], strides = [1, 1]} : vector<32x64xf32> to vector<32x32xf32>
    %84 = vector.extract_strided_slice %82 {offsets = [0, 32], sizes = [32, 32], strides = [1, 1]} : vector<32x64xf32> to vector<32x32xf32>
    %85 = arith.addf %83, %33 : vector<32x32xf32>
    %86 = arith.mulf %81, %85 : vector<32x32xf32>
    %cst_31 = arith.constant dense<0.000000e+00> : vector<32xf32>
    %87 = vector.multi_reduction <add>, %86, %cst_31 [1] : vector<32x32xf32> to vector<32xf32>
    %88 = vector.shape_cast %87 : vector<32xf32> to vector<32x1xf32>
    %cst_32 = arith.constant 0.176776692 : f32
    %89 = vector.broadcast %cst_32 : f32 to vector<32x1xf32>
    %90 = arith.mulf %88, %89 : vector<32x1xf32>
    %91 = tpu.transpose %90, [1, 0] : vector<32x1xf32> -> vector<1x32xf32>
    %cst_33 = arith.constant -1.000000e+30 : f32
    %92 = vector.shape_cast %91 : vector<1x32xf32> to vector<1x32xf32>
    %93 = vector.broadcast %92 : vector<1x32xf32> to vector<16x32xf32>
    %94 = vector.broadcast %cst_33 : f32 to vector<16x32xf32>
    %95 = arith.select %21, %93, %94 : vector<16x32xi1>, vector<16x32xf32>
    %cst_34 = arith.constant dense<0xFF800000> : vector<16xf32>
    %96 = vector.multi_reduction <maximumf>, %95, %cst_34 [1] : vector<16x32xf32> to vector<16xf32>
    %97 = vector.shape_cast %96 : vector<16xf32> to vector<16x1xf32>
    %98 = vector.broadcast %97 : vector<16x1xf32> to vector<16x32xf32>
    %99 = arith.subf %95, %98 : vector<16x32xf32>
    %100 = math.exp %99 : vector<16x32xf32>
    %cst_35 = arith.constant 0.000000e+00 : f32
    %101 = vector.broadcast %cst_35 : f32 to vector<16x32xf32>
    %102 = arith.select %21, %100, %101 : vector<16x32xi1>, vector<16x32xf32>
    %cst_36 = arith.constant dense<0.000000e+00> : vector<16xf32>
    %103 = vector.multi_reduction <add>, %102, %cst_36 [1] : vector<16x32xf32> to vector<16xf32>
    %104 = vector.shape_cast %103 : vector<16xf32> to vector<16x1xf32>
    %cst_37 = arith.constant 1.000000e-16 : f32
    %105 = vector.broadcast %cst_37 : f32 to vector<16x1xf32>
    %106 = arith.maximumf %104, %105 : vector<16x1xf32>
    %107 = vector.broadcast %106 : vector<16x1xf32> to vector<16x32xf32>
    %108 = arith.divf %102, %107 : vector<16x32xf32>
    %109 = arith.addf %84, %33 : vector<32x32xf32>
    %cst_38 = arith.constant dense<0.000000e+00> : vector<16x32xf32>
    %110 = tpu.matmul %108, %109, %cst_38 {dimension_numbers = #tpu.dot_dimension_numbers<[1], [0], [0], [1], [0, 0, 1, 1], [], []>} : vector<16x32xf32>, vector<32x32xf32>, vector<16x32xf32> -> vector<16x32xf32>
    %111 = arith.addf %80, %110 : vector<16x32xf32>
    %112 = math.tanh %111 : vector<16x32xf32>
    %cst_39 = arith.constant 1.000000e-01 : f32
    %113 = vector.broadcast %cst_39 : f32 to vector<16x32xf32>
    %114 = arith.mulf %113, %112 : vector<16x32xf32>
    %115 = arith.addf %74, %114 : vector<16x32xf32>
    %cst_40 = arith.constant dense<0.000000e+00> : vector<24x32xf32>
    %116 = tpu.matmul %22, %115, %cst_40 {dimension_numbers = #tpu.dot_dimension_numbers<[1], [0], [0], [1], [0, 0, 1, 1], [], []>} : vector<24x16xf32>, vector<16x32xf32>, vector<24x32xf32> -> vector<24x32xf32>
    %cst_41 = arith.constant dense<0.000000e+00> : vector<24x64xf32>
    %117 = tpu.matmul %116, %3, %cst_41 {dimension_numbers = #tpu.dot_dimension_numbers<[1], [0], [0], [1], [0, 0, 1, 1], [], []>} : vector<24x32xf32>, vector<32x64xf32>, vector<24x64xf32> -> vector<24x64xf32>
    %118 = vector.extract_strided_slice %117 {offsets = [0, 0], sizes = [8, 32], strides = [1, 1]} : vector<24x64xf32> to vector<8x32xf32>
    %119 = vector.broadcast %10 : vector<1x32xf32> to vector<8x32xf32>
    %120 = arith.addf %118, %119 : vector<8x32xf32>
    %121 = vector.extract_strided_slice %117 {offsets = [8, 32], sizes = [8, 32], strides = [1, 1]} : vector<24x64xf32> to vector<8x32xf32>
    %122 = vector.broadcast %11 : vector<1x32xf32> to vector<8x32xf32>
    %123 = arith.addf %121, %122 : vector<8x32xf32>
    %124 = vector.extract_strided_slice %117 {offsets = [16, 32], sizes = [8, 32], strides = [1, 1]} : vector<24x64xf32> to vector<8x32xf32>
    %125 = vector.broadcast %11 : vector<1x32xf32> to vector<8x32xf32>
    %126 = arith.addf %124, %125 : vector<8x32xf32>
    %127 = arith.addf %120, %123 : vector<8x32xf32>
    %128 = arith.addf %120, %126 : vector<8x32xf32>
    %129 = tpu.concatenate %127, %128 in 0 : vector<8x32xf32>, vector<8x32xf32> -> vector<16x32xf32>
    %cst_42 = arith.constant 0.000000e+00 : f32
    %130 = vector.broadcast %cst_42 : f32 to vector<16x32xf32>
    %131 = arith.maximumf %129, %130 : vector<16x32xf32>
    %cst_43 = arith.constant dense<0.000000e+00> : vector<16x1xf32>
    %132 = tpu.matmul %131, %4, %cst_43 {dimension_numbers = #tpu.dot_dimension_numbers<[1], [0], [0], [1], [0, 0, 1, 1], [], []>} : vector<16x32xf32>, vector<32x1xf32>, vector<16x1xf32> -> vector<16x1xf32>
    %133 = vector.broadcast %12 : vector<1x1xf32> to vector<16x1xf32>
    %134 = arith.addf %132, %133 : vector<16x1xf32>
    %135 = vector.extract_strided_slice %116 {offsets = [0, 0], sizes = [8, 32], strides = [1, 1]} : vector<24x32xf32> to vector<8x32xf32>
    %136 = vector.extract_strided_slice %116 {offsets = [8, 0], sizes = [8, 32], strides = [1, 1]} : vector<24x32xf32> to vector<8x32xf32>
    %137 = vector.extract_strided_slice %134 {offsets = [0, 0], sizes = [8, 1], strides = [1, 1]} : vector<16x1xf32> to vector<8x1xf32>
    %138 = vector.shape_cast %137 : vector<8x1xf32> to vector<8x1xf32>
    %139 = vector.broadcast %138 : vector<8x1xf32> to vector<8x32xf32>
    %140 = vector.extract_strided_slice %134 {offsets = [8, 0], sizes = [8, 1], strides = [1, 1]} : vector<16x1xf32> to vector<8x1xf32>
    %141 = vector.shape_cast %140 : vector<8x1xf32> to vector<8x1xf32>
    %142 = vector.broadcast %141 : vector<8x1xf32> to vector<8x32xf32>
    %143 = tpu.concatenate %135, %136, %139, %142 in 1 : vector<8x32xf32>, vector<8x32xf32>, vector<8x32xf32>, vector<8x32xf32> -> vector<8x128xf32>
    %c0_44 = arith.constant 0 : index
    %c0_45 = arith.constant 0 : index
    %144 = vector.load %arg2[%c0_44, %c0_45] : memref<8x128xf32, #tpu.memory_space<vmem>>, vector<8x128xf32>
    tpu.vector_store %arg2[%c0_44, %c0_45], %143 {strides = array<i32>} : memref<8x128xf32, #tpu.memory_space<vmem>>, vector<8x128xf32>,
    return
  }
}

</mosaic_0001>

<bundles_post_ra>
// kernel: ctan_forward.1
= control target key start
LH: loop header
LB: loop body
LE: loop exit
PB: predicated region body
PF: predicated region fallthrough
CT: control target
= control target key end

     0   :  { %vm707_vm0 = vcmask 261120   ;;  %v68_v0 = vlaneseq  ;;  %v2451_v4 = vmov 0   ;;  %s2452_s3 = smov 112   ;;  %s2453_s4 = smov 127   ;;  %vm504_vm1 = vcmask 64512   ;;  %s3206_s1 = inlined_call_operand.vmem [shape: f32[128,128], index: 1, kind: input, shape index: {}]   ;;  %s3207_s0 = inlined_call_operand.vmem [shape: f32[152,32], index: 0, kind: input, shape index: {}]   ;;  %s3208_s2 = inlined_call_operand.vmem [shape: f32[8,128], index: 2, kind: output, shape index: {}]  }
   0x1   :  { %v11_v1 = vld [vmem:[%s3206_s1] sm:$0xff]  ;;  %v12_v2 = vld [vmem:[%s3206_s1 + $0x8] sm:$0xff]  ;;  %v13_v3 = vld [vmem:[%s3206_s1 + $0x10] sm:$0xff]  ;;  %2376 = vset.pattern.permute.xlu0 %v2451_v4  ;;  %2377 = vset.pattern.permute.xlu1 %v2451_v4  ;;  %s2454_s5 = smov 96   ;;  %v2456_v4 = vmov 2475754826  }
   0x2   :  { %v2490_v5 = vpack.c.bf16 %v12_v2, %v11_v1  ;;  %v14_v6 = vld [vmem:[%s3206_s1 + $0x18] sm:$0xff]  ;;  %v27_v7 = vld [vmem:[%s3207_s0] sm:$0xff]  ;;  %v2498_v8 = vshrl.u32 %v68_v0, 7  ;;  %v29_v10 = vld [vmem:[%s3207_s0 + $0x10] sm:$0xff]  ;;  %v2455_v2 = vmov 683565275  }
   0x3   :  { %v2500_v9 = vpack.c.bf16 %v14_v6, %v13_v3  ;;  %2155 = vmatprep.mubr.msk.f32.mxu1 %vm707_vm0, %v27_v7  ;;  %v31_v11 = vld [vmem:[%s3207_s0 + $0x20] sm:$0xff]  ;;  %50 = vperm.xlu0 %2376, %v29_v10   ;;  %v30_v13 = vld [vmem:[%s3207_s0 + $0x18] sm:$0xff]  ;;  %v32_v15 = vld [vmem:[%s3207_s0 + $0x28] sm:$0xff]  ;;  %s2465_s24 = smov 64  }
   0x4   :  { %2277 = vmatprep.subr.bf16.mxu1 %v2490_v5  ;;  %v70_v12 = vsub.s32 1, %v2498_v8  ;;  %60 = vperm.xlu1 %2377, %v31_v11   ;;  %v2518_v14 = vld [vmem:[%s3206_s1 + $0x78] sm:$0xff]  ;;  %v28_v17 = vld [vmem:[%s3207_s0 + $0x8] sm:$0xff]  ;;  %v17_v18 = vld [vmem:[%s3206_s1 + $0x30] sm:$0xff] }
   0x5   :  { %2279 = vmatpush3.bf16.msra.mxu1 %v2490_v5  ;;  %v15_v19 = vld [vmem:[%s3206_s1 + $0x20] sm:$0xff]  ;;  %v16_v20 = vld [vmem:[%s3206_s1 + $0x28] sm:$0xff]  ;;  %2129 = vmatprep.subr.mxu0 %v17_v18 }
   0x6   :  { %2281 = vmatprep.subr.bf16.mxu1 %v2500_v9  ;;  %v2525_v16 = vrot.slane %v2518_v14, %v70_v12  ;;  %v2272_v21 = vpack.c.bf16 %v16_v20, %v15_v19  ;;  %2130 = vmatpush3.msra.mxu0 %v17_v18  ;;  %v2458_v12 = vmov 2102212464  }
   0x7   :  { %55 = vperm.xlu0 %2376, %v30_v13  }
   0x8   :  { %65 = vperm.xlu1 %2377, %v32_v15   ;;  %2273 = vmatprep.subr.bf16.mxu0 %v2272_v21 }
   0x9   :  { %2283 = vmatpush3.bf16.msra.mxu1 %v2500_v9 }
   0xb   :  { %77 = vrot.lane.b32.xlu0 %v2525_v16, %s2452_s3 }
   0xc   :  { %2156 = vmatmul.mubr.msk.f32.vlgmr.msra.gmra.mrb[0].mxu1 %vm707_vm0, %v28_v17  ;;  %496 = vrot.lane.b32.xlu1 %v29_v10, %s2453_s4  ;;  %v2457_v10 = vmov 2131351028  }
   0xf   :  { %498 = vrot.lane.b32.xlu0 %v30_v13, %s2453_s4 }
  0x10   :  { %500 = vrot.lane.b32.xlu1 %v31_v11, %s2453_s4 }
  0x13   :  { %502 = vrot.lane.b32.xlu0 %v32_v15, %s2453_s4  ;;  %v2459_v15 = vmov 920167782   ;;  %s2461_s4 = smov 32  }
  0x17   :  { %696 = vrot.lane.b32.xlu0 %v2525_v16, %s2454_s5 }
  0x82   :  { %v51_v22 = vpop.permute.xlu0 %50 }
  0x83   :  { %v61_v23 = vpop.permute.xlu1 %60  ;;  %v72_v25 = vmul.f32 %v2525_v16, %v51_v22 }
  0x84   :  { %v74_v27 = vmul.f32 %v2525_v16, %v61_v23  ;;  %v2460_v23 = vmov 1326507024  }
  0x86   :  { %v56_v24 = vpop.permute.xlu0 %55 }
  0x87   :  { %v73_v26 = vmul.f32 %v2525_v16, %v56_v24  ;;  %v66_v28 = vpop.permute.xlu1 %65 }
  0x88   :  { %v75_v29 = vmul.f32 %v2525_v16, %v66_v28 }
  0x8a   :  { %v78_v30 = vpop.permute.xlu0 %77 }
  0x8b   :  { %v2548_v31 = vadd.f32 %v78_v30, %v72_v25  ;;  %v2550_v32 = vadd.f32 %v78_v30, %v73_v26  ;;  %v2552_v33 = vadd.f32 %v78_v30, %v74_v27  ;;  %v497_v34 = vpop.permute.xlu1 %496  ;;  %v2554_v35 = vadd.f32 %v78_v30, %v75_v29 }
  0x8c   :  { %2131 = vmatprep.mubr.msk.f32.mxu0 %vm504_vm1, %v497_v34 }
  0x8d   :  { %v87_v36 = vand.u32 2139095040, %v2548_v31  ;;  %v187_v37 = vand.u32 2147483647, %v2550_v32  ;;  %v190_v38 = vand.u32 2139095040, %v2550_v32  ;;  %v293_v39 = vand.u32 2139095040, %v2552_v33 }
  0x8e   :  { %v499_v40 = vpop.permute.xlu0 %498  ;;  %v396_v46 = vand.u32 2139095040, %v2554_v35  ;;  %v84_v47 = vand.u32 2147483647, %v2548_v31 }
  0x8f   :  { %v88_v41 = vshrl.u32 %v87_v36, 23  ;;  %v191_v42 = vshrl.u32 %v190_v38, 23  ;;  %2132 = vmatmul.mubr.msk.f32.vlgmr.msra.gmra.mrb[0].mxu0 %vm504_vm1, %v499_v40  ;;  %v501_v43 = vpop.permute.xlu1 %500  ;;  %v194_v44 = vand.u32 8388607, %v187_v37  ;;  %v294_v45 = vshrl.u32 %v293_v39, 23 }
  0x90   :  { %2134 = vmatprep.mubr.msk.f32.mxu0 %vm504_vm1, %v501_v43  ;;  %2275 = vmatpush3.bf16.msra.mxu0 %v2272_v21  ;;  %v397_v55 = vshrl.u32 %v396_v46, 23  ;;  %v2570_v56 = vand.u32 8388607, %v84_v47  ;;  %v290_v43 = vand.u32 2147483647, %v2552_v33 }
  0x91   :  { %v1996_v48 = vadd.s32 4294967169, %v88_v41  ;;  %v2000_v49 = vadd.s32 4294967169, %v191_v42  ;;  %v2004_v50 = vadd.s32 4294967169, %v294_v45  ;;  %v195_v54 = vor.u32 8388608, %v194_v44 }
  0x92   :  { %v503_v51 = vpop.permute.xlu0 %502  ;;  %v2008_v63 = vadd.s32 4294967169, %v397_v55  ;;  %v92_v0 = vor.u32 8388608, %v2570_v56 }
  0x93   :  { %v94_v52 = vadd.s32 1, %v1996_v48  ;;  %v197_v53 = vadd.s32 1, %v2000_v49  ;;  %2135 = vmatmul.mubr.msk.f32.gmra.mrb[2].mxu0 %vm504_vm1, %v503_v51  ;;  %v300_v57 = vadd.s32 1, %v2004_v50  ;;  %v2574_v62 = vshll.u32 %v195_v54, 8 }
  0x94   :  { %v403_v48 = vadd.s32 1, %v2008_v63 }
  0x95   :  { %vm95_vm2 = vcmp.gt.s32.totalorder %v94_v52, 0  ;;  %vm198_vm3 = vcmp.gt.s32.totalorder %v197_v53, 0  ;;  %vm301_vm4 = vcmp.gt.s32.totalorder %v300_v57, 0 }
  0x96   :  { %v199_v58 = vsel %vm198_vm3, %v197_v53, 0  ;;  %v2572_v59 = vsel %vm95_vm2, %v94_v52, 0  ;;  %v302_v25 = vsel %vm301_vm4, %v300_v57, 0  ;;  %v2610_v57 = vand.u32 8388607, %v290_v43 }
  0x97   :  { %v201_v60 = vand.u32 31, %v199_v58  ;;  %v200_v61 = vshrl.u32 %v199_v58, 5  ;;  %v2580_v7 = vand.u32 31, %v2572_v59  ;;  %v2593_v46 = vand.u32 31, %v302_v25 }
  0x98   :  { %vm404_vm9 = vcmp.gt.s32.totalorder %v403_v48, 0 }
  0x99   :  { %v202_v1 = vsub.s32 32, %v201_v60  ;;  %v204_v3 = vshll.u32 %v2455_v2, %v201_v60  ;;  %v207_v6 = vshll.u32 %v2456_v4, %v201_v60  ;;  %v210_v11 = vshll.u32 %v2457_v10, %v201_v60 }
  0x9a   :  { %v213_v13 = vshll.u32 %v2458_v12, %v201_v60  ;;  %v216_v17 = vshll.u32 %v2459_v15, %v201_v60  ;;  %vm219_vm5 = vcmp.lt.s32.totalorder %v200_v61, 1  ;;  %vm222_vm6 = vcmp.lt.s32.totalorder %v200_v61, 4 }
  0x9b   :  { %v203_v18 = vshrl.u32 %v2455_v2, %v202_v1  ;;  %v205_v19 = vshrl.u32 %v2456_v4, %v202_v1  ;;  %v208_v20 = vshrl.u32 %v2457_v10, %v202_v1  ;;  %v211_v21 = vshrl.u32 %v2458_v12, %v202_v1 }
  0x9c   :  { %v214_v22 = vshrl.u32 %v2459_v15, %v202_v1  ;;  %v217_v24 = vshrl.u32 %v2460_v23, %v202_v1  ;;  %vm220_vm7 = vcmp.lt.s32.totalorder %v200_v61, 2  ;;  %vm221_vm8 = vcmp.lt.s32.totalorder %v200_v61, 3 }
  0x9d   :  { %v206_v26 = vor.u32 %v205_v19, %v204_v3  ;;  %v209_v27 = vor.u32 %v208_v20, %v207_v6  ;;  %v212_v28 = vor.u32 %v211_v21, %v210_v11  ;;  %v99_v49 = vsub.s32 32, %v2580_v7 }
  0x9e   :  { %v215_v29 = vor.u32 %v214_v22, %v213_v13  ;;  %v218_v30 = vor.u32 %v217_v24, %v216_v17  ;;  %v2613_v58 = vsub.s32 32, %v2593_v46  ;;  %v2616_v61 = vshll.u32 %v92_v0, 8 }
  0x9f   :  { %v223_v34 = vsel %vm219_vm5, %v203_v18, %v206_v26  ;;  %v224_v36 = vsel %vm222_vm6, %v212_v28, 2102212464  ;;  %v227_v38 = vsel %vm219_vm5, %v206_v26, %v209_v27  ;;  %v231_v39 = vsel %vm219_vm5, %v209_v27, %v212_v28 }
  0xa0   :  { %v225_v40 = vsel %vm221_vm8, %v209_v27, %v224_v36  ;;  %v228_v41 = vsel %vm222_vm6, %v215_v29, 920167782  ;;  %v232_v42 = vsel %vm222_vm6, %v218_v30, 1326507024  ;;  %v101_v1 = vshll.u32 %v2455_v2, %v2580_v7 }
  0xa1   :  { %v229_v44 = vsel %vm221_vm8, %v212_v28, %v228_v41  ;;  %v233_v45 = vsel %vm221_vm8, %v215_v29, %v232_v42  ;;  %v226_v50 = vsel %vm220_vm7, %v223_v34, %v225_v40  ;;  %v102_v3 = vshrl.u32 %v2456_v4, %v99_v49 }
  0xa2   :  { %v230_v51 = vsel %vm220_vm7, %v227_v38, %v229_v44  ;;  %v234_v52 = vsel %vm220_vm7, %v231_v39, %v233_v45  ;;  %v242_v60 = vmul.u32 %v2574_v62, %v226_v50  ;;  %v97_v6 = vshrl.u32 %v2572_v59, 5 }
  0xa3   :  { %v2600_v53 = vmul.u32.u64.low %v2574_v62, %v234_v52  ;;  %v2601_v54 = vmul.u32.u64.high %v2574_v62, %v234_v52, %v2600_v53  ;;  %v2604_v55 = vmul.u32.u64.low %v2574_v62, %v230_v51  ;;  %v2605_v56 = vmul.u32.u64.high %v2574_v62, %v230_v51, %v2604_v55 }
  0xa4   :  { %v2625_v11 = vsel %vm404_vm9, %v403_v48, 0  ;;  %v104_v13 = vshll.u32 %v2456_v4, %v2580_v7  ;;  %v298_v62 = vor.u32 8388608, %v2610_v57  ;;  %v2631_v17 = vshrl.u32 %v302_v25, 5 }
  0xa5   :  { %vm244_vm10 = vc.u32 %v2601_v54, %v2604_v55  ;;  %v245_v63 = vadd.s32 1, %v2605_v56  ;;  %v316_v18 = vshll.u32 %v2458_v12, %v2593_v46  ;;  %v317_v19 = vshrl.u32 %v2459_v15, %v2613_v58 }
  0xa6   :  { %v105_v59 = vshrl.u32 %v2457_v10, %v99_v49  ;;  %v107_v21 = vshll.u32 %v2457_v10, %v2580_v7  ;;  %v108_v22 = vshrl.u32 %v2458_v12, %v99_v49  ;;  %v100_v24 = vshrl.u32 %v2455_v2, %v99_v49 }
  0xa7   :  { %v246_v0 = vsel %vm244_vm10, %v245_v63, %v2605_v56  ;;  %v103_v26 = vor.u32 %v102_v3, %v101_v1  ;;  %v110_v25 = vshll.u32 %v2458_v12, %v2580_v7  ;;  %v111_v27 = vshrl.u32 %v2459_v15, %v99_v49 }
  0xa8   :  { %v247_v20 = vadd.s32 %v246_v0, %v242_v60  ;;  %v106_v29 = vor.u32 %v105_v59, %v104_v13  ;;  %v109_v30 = vor.u32 %v108_v22, %v107_v21  ;;  %v113_v34 = vshll.u32 %v2459_v15, %v2580_v7 }
  0xa9   :  { %v2647_v36 = vor.u32 %v317_v19, %v316_v18  ;;  %v319_v38 = vshll.u32 %v2459_v15, %v2593_v46  ;;  %v112_v39 = vor.u32 %v111_v27, %v110_v25  ;;  %v114_v40 = vshrl.u32 %v2460_v23, %v99_v49 }
  0xaa   :  { %v248_v28 = vadd.s32 536870912, %v247_v20  ;;  %vm116_vm11 = vcmp.lt.s32.totalorder %v97_v6, 1  ;;  %vm117_vm12 = vcmp.lt.s32.totalorder %v97_v6, 2  ;;  %vm118_vm13 = vcmp.lt.s32.totalorder %v97_v6, 3 }
  0xab   :  { %v115_v42 = vor.u32 %v114_v40, %v113_v34  ;;  %vm119_vm14 = vcmp.lt.s32.totalorder %v97_v6, 4  ;;  %v120_v44 = vsel %vm116_vm11, %v100_v24, %v103_v26  ;;  %v124_v45 = vsel %vm116_vm11, %v103_v26, %v106_v29 }
  0xac   :  { %v2652_v41 = vshrl.u32 %v248_v28, 30  ;;  %v121_v7 = vsel %vm119_vm14, %v109_v30, 2102212464  ;;  %v125_v50 = vsel %vm119_vm14, %v112_v39, 920167782  ;;  %v128_v51 = vsel %vm116_vm11, %v106_v29, %v109_v30 }
  0xad   :  { %v320_v52 = vshrl.u32 %v2460_v23, %v2613_v58  ;;  %v122_v53 = vsel %vm118_vm13, %v106_v29, %v121_v7  ;;  %v126_v49 = vsel %vm118_vm13, %v109_v30, %v125_v50  ;;  %v129_v56 = vsel %vm119_vm14, %v115_v42, 1326507024 }
  0xae   :  { %v250_v48 = vshll.u32 %v2652_v41, 30  ;;  %vm325_vm15 = vcmp.lt.s32.totalorder %v2631_v17, 4  ;;  %v127_v63 = vsel %vm117_vm12, %v124_v45, %v126_v49  ;;  %v130_v1 = vsel %vm118_vm13, %v112_v39, %v129_v56 }
  0xaf   :  { %v123_v3 = vsel %vm117_vm12, %v120_v44, %v122_v53  ;;  %v131_v13 = vsel %vm117_vm12, %v128_v51, %v130_v1  ;;  %v2667_v0 = vmul.u32.u64.low %v2616_v61, %v127_v63  ;;  %v2668_v18 = vmul.u32.u64.high %v2616_v61, %v127_v63, %v2667_v0 }
  0xb0   :  { %v2659_v60 = vsub.s32 %v247_v20, %v250_v48  ;;  %v2673_v20 = vand.u32 31, %v2625_v11  ;;  %v2676_v59 = vmul.u32.u64.low %v2616_v61, %v131_v13  ;;  %v2677_v21 = vmul.u32.u64.high %v2616_v61, %v131_v13, %v2676_v59 }
  0xb1   :  { %v321_v22 = vor.u32 %v320_v52, %v319_v38  ;;  %v331_v6 = vsel %vm325_vm15, %v2647_v36, 920167782  ;;  %v307_v24 = vshll.u32 %v2455_v2, %v2593_v46  ;;  %v308_v26 = vshrl.u32 %v2456_v4, %v2613_v58 }
  0xb2   :  { %v253_v19 = vsub.s32 0, %v2659_v60  ;;  %v139_v27 = vmul.u32 %v2616_v61, %v123_v3  ;;  %v310_v28 = vshll.u32 %v2456_v4, %v2593_v46  ;;  %v311_v29 = vshrl.u32 %v2457_v10, %v2613_v58 }
  0xb3   :  { %v142_v30 = vadd.s32 1, %v2668_v18  ;;  %v309_v34 = vor.u32 %v308_v26, %v307_v24  ;;  %v313_v38 = vshll.u32 %v2457_v10, %v2593_v46  ;;  %v314_v39 = vshrl.u32 %v2458_v12, %v2613_v58 }
  0xb4   :  { %v2001_v25 = vmin.u32 %v253_v19, %v2659_v60  ;;  %v243_v40 = vadd.s32 %v2604_v55, %v2601_v54  ;;  %v2700_v61 = vsub.s32 32, %v2673_v20  ;;  %vm141_vm1 = vc.u32 %v2677_v21, %v2667_v0 }
  0xb5   :  { %v335_v44 = vsel %vm325_vm15, %v321_v22, 1326507024  ;;  %v419_v45 = vshll.u32 %v2458_v12, %v2673_v20  ;;  %v143_v46 = vsel %vm141_vm1, %v142_v30, %v2668_v18  ;;  %v312_v48 = vor.u32 %v311_v29, %v310_v28 }
  0xb6   :  { %v255_v42 = vclz %v2001_v25  ;;  %v144_v50 = vadd.s32 %v143_v46, %v139_v27  ;;  %v315_v51 = vor.u32 %v314_v39, %v313_v38  ;;  %vm322_vm2 = vcmp.lt.s32.totalorder %v2631_v17, 1 }
  0xb7   :  { %v306_v54 = vshrl.u32 %v2455_v2, %v2613_v58  ;;  %vm323_vm3 = vcmp.lt.s32.totalorder %v2631_v17, 2  ;;  %vm324_vm4 = vcmp.lt.s32.totalorder %v2631_v17, 3  ;;  %v330_v55 = vsel %vm322_vm2, %v309_v34, %v312_v48 }
  0xb8   :  { %v2002_v7 = vadd.s32 4294967294, %v255_v42  ;;  %v145_v52 = vadd.s32 536870912, %v144_v50  ;;  %v327_v53 = vsel %vm325_vm15, %v315_v51, 2102212464  ;;  %v332_v49 = vsel %vm324_vm4, %v315_v51, %v331_v6 }
  0xb9   :  { %v420_v63 = vshrl.u32 %v2459_v15, %v2700_v61  ;;  %v333_v58 = vsel %vm323_vm3, %v330_v55, %v332_v49  ;;  %v334_v1 = vsel %vm322_vm2, %v312_v48, %v315_v51  ;;  %v326_v59 = vsel %vm322_vm2, %v306_v54, %v309_v34 }
  0xba   :  { %vm2003_vm5 = vcmp.lt.s32.totalorder %v2002_v7, 0  ;;  %v2727_v19 = vshrl.u32 %v145_v52, 30  ;;  %v328_v22 = vsel %vm324_vm4, %v312_v48, %v327_v53  ;;  %v336_v6 = vsel %vm324_vm4, %v2647_v36, %v335_v44 }
  0xbb   :  { %v258_v56 = vsel %vm2003_vm5, 0, %v2002_v7  ;;  %v338_v24 = vshll.u32 %v298_v62, 8  ;;  %v2744_v28 = vshll.u32 %v2459_v15, %v2673_v20  ;;  %v337_v29 = vsel %vm323_vm3, %v334_v1, %v336_v6 }
  0xbc   :  { %v259_v3 = vsub.s32 32, %v258_v56  ;;  %v260_v13 = vshll.u32 %v2659_v60, %v258_v56  ;;  %v263_v18 = vsub.s32 4294967266, %v258_v56  ;;  %v2739_v60 = vshrl.u32 %v2625_v11, 5 }
  0xbd   :  { %v147_v27 = vshll.u32 %v2727_v19, 30  ;;  %v2748_v30 = vmul.u32.u64.low %v338_v24, %v333_v58  ;;  %v2749_v34 = vmul.u32.u64.high %v338_v24, %v333_v58, %v2748_v30  ;;  %v329_v11 = vsel %vm323_vm3, %v326_v59, %v328_v22 }
  0xbe   :  { %v261_v26 = vshrl.u32 %v243_v40, %v259_v3  ;;  %v264_v25 = vadd.s32 127, %v263_v18  ;;  %v2754_v38 = vor.u32 %v420_v63, %v419_v45  ;;  %v423_v39 = vshrl.u32 %v2460_v23, %v2700_v61 }
  0xbf   :  { %v148_v36 = vsub.s32 %v144_v50, %v147_v27  ;;  %v2758_v15 = vmul.u32.u64.low %v338_v24, %v337_v29  ;;  %v2759_v40 = vmul.u32.u64.high %v338_v24, %v337_v29, %v2758_v15  ;;  %vm428_vm6 = vcmp.lt.s32.totalorder %v2739_v60, 4 }
  0xc0   :  { %v262_v57 = vor.u32 %v261_v26, %v260_v13  ;;  %v265_v62 = vshll.u32 %v264_v25, 23  ;;  %v345_v48 = vmul.u32 %v338_v24, %v329_v11  ;;  %v348_v7 = vadd.s32 1, %v2749_v34 }
  0xc1   :  { %v150_v46 = vsub.s32 0, %v148_v36  ;;  %vm189_vm7 = vcmp.lt.s32.totalorder %v2550_v32, 0  ;;  %vm2766_vm8 = vcmp.le.f32.partialorder %v187_v37, 0.7853982  ;;  %v424_v23 = vor.u32 %v423_v39, %v2744_v28 }
  0xc2   :  { %v266_v42 = vor.u32 4788187, %v265_v62  ;;  %v269_v44 = vcvt.s32.f32 %v262_v57  ;;  %v434_v51 = vsel %vm428_vm6, %v2754_v38, 920167782  ;;  %vm347_vm9 = vc.u32 %v2759_v40, %v2748_v30 }
  0xc3   :  { %v1997_v50 = vmin.u32 %v150_v46, %v148_v36  ;;  %v393_v54 = vand.u32 2147483647, %v2554_v35  ;;  %v349_v53 = vsel %vm347_vm9, %v348_v7, %v2749_v34  ;;  %v410_v37 = vshll.u32 %v2455_v2, %v2673_v20 }
  0xc4   :  { %v267_v17 = vand.u32 2147483647, %v266_v42  ;;  %v350_v49 = vadd.s32 %v349_v53, %v345_v48  ;;  %v411_v56 = vshrl.u32 %v2456_v4, %v2700_v61  ;;  %v413_v63 = vshll.u32 %v2456_v4, %v2673_v20 }
  0xc5   :  { %v152_v52 = vclz %v1997_v50  ;;  %v414_v58 = vshrl.u32 %v2457_v10, %v2700_v61  ;;  %v416_v13 = vshll.u32 %v2457_v10, %v2673_v20  ;;  %v417_v18 = vshrl.u32 %v2458_v12, %v2700_v61 }
  0xc6   :  { %v270_v55 = vmul.f32 %v269_v44, %v267_v17  ;;  %v140_v59 = vadd.s32 %v2667_v0, %v2677_v21  ;;  %v351_v22 = vadd.s32 536870912, %v350_v49  ;;  %v400_v6 = vand.u32 8388607, %v393_v54 }
  0xc7   :  { %v1998_v3 = vadd.s32 4294967294, %v152_v52  ;;  %v409_v4 = vshrl.u32 %v2455_v2, %v2700_v61  ;;  %v412_v26 = vor.u32 %v411_v56, %v410_v37  ;;  %v415_v25 = vor.u32 %v414_v58, %v413_v63 }
  0xc8   :  { %v271_v1 = vxor.u32 2147483648, %v270_v55  ;;  %v2798_v20 = vshrl.u32 %v351_v22, 30  ;;  %v418_v12 = vor.u32 %v417_v18, %v416_v13  ;;  %vm425_vm11 = vcmp.lt.s32.totalorder %v2739_v60, 1 }
  0xc9   :  { %vm1999_vm10 = vcmp.lt.s32.totalorder %v1998_v3, 0  ;;  %vm427_vm12 = vcmp.lt.s32.totalorder %v2739_v60, 3  ;;  %v401_v28 = vor.u32 8388608, %v400_v6  ;;  %vm426_vm13 = vcmp.lt.s32.totalorder %v2739_v60, 2 }
  0xca   :  { %v272_v24 = vsel %vm189_vm7, %v271_v1, %v270_v55  ;;  %v155_v10 = vsel %vm1999_vm10, 0, %v1998_v3  ;;  %v353_v61 = vshll.u32 %v2798_v20, 30  ;;  %v430_v57 = vsel %vm428_vm6, %v418_v12, 2102212464 }
  0xcb   :  { %v156_v0 = vsub.s32 32, %v155_v10  ;;  %v157_v21 = vshll.u32 %v148_v36, %v155_v10  ;;  %v160_v27 = vsub.s32 4294967266, %v155_v10  ;;  %v275_v2 = vsel %vm2766_vm8, %v2550_v32, %v272_v24 }
  0xcc   :  { %v433_v62 = vsel %vm425_vm11, %v412_v26, %v415_v25  ;;  %v438_v36 = vsel %vm428_vm6, %v424_v23, 1326507024  ;;  %v2813_v11 = vsub.s32 %v350_v49, %v353_v61  ;;  %v435_v39 = vsel %vm427_vm12, %v418_v12, %v434_v51 }
  0xcd   :  { %v158_v29 = vshrl.u32 %v140_v59, %v156_v0  ;;  %v161_v34 = vadd.s32 127, %v160_v27  ;;  %2408 = vcosq.f32 %v275_v2  ;;  %v429_v44 = vsel %vm425_vm11, %v409_v4, %v412_v26 }
  0xce   :  { %v356_v46 = vsub.s32 0, %v2813_v11  ;;  %v431_v48 = vsel %vm427_vm12, %v415_v25, %v430_v57  ;;  %v436_v7 = vsel %vm426_vm13, %v433_v62, %v435_v39  ;;  %v437_v17 = vsel %vm425_vm11, %v415_v25, %v418_v12 }
  0xcf   :  { %v159_v15 = vor.u32 %v158_v29, %v157_v21  ;;  %v162_v42 = vshll.u32 %v161_v34, 23  ;;  %v439_v51 = vsel %vm427_vm12, %v2754_v38, %v438_v36  ;;  %v441_v55 = vshll.u32 %v401_v28, 8  ;;  %v2883_v36 = vld [vmem:[%s3207_s0 + $0x50] sm:$0xff] }
  0xd0   :  { %v2830_v52 = vsub.s32 0, %v2498_v8  ;;  %v273_v53 = vsub.s32 4, %v2652_v41  ;;  %2410 = vsinq.f32 %v275_v2  ;;  %v2005_v37 = vmin.u32 %v356_v46, %v2813_v11 }
  0xd1   :  { %v163_v50 = vor.u32 4788187, %v162_v42  ;;  %v166_v23 = vcvt.s32.f32 %v159_v15  ;;  %v440_v56 = vsel %vm426_vm13, %v437_v17, %v439_v51  ;;  %v432_v38 = vsel %vm426_vm13, %v429_v44, %v431_v48 }
  0xd2   :  { %v2836_v63 = vmul.u32.u64.low %v441_v55, %v436_v7  ;;  %v2837_v58 = vmul.u32.u64.high %v441_v55, %v436_v7, %v2836_v63  ;;  %v358_v1 = vclz %v2005_v37  ;;  %vm2847_vm14 = vcmp.le.f32.partialorder %v84_v47, 0.7853982  ;;  %v2903_v37 = vld [vmem:[%s3207_s0 + $0x58] sm:$0xff] }
  0xd3   :  { %v164_v49 = vand.u32 2147483647, %v163_v50  ;;  %v2842_v3 = vmul.u32.u64.low %v441_v55, %v440_v56  ;;  %v2843_v13 = vmul.u32.u64.high %v441_v55, %v440_v56, %v2842_v3  ;;  %vm86_vm15 = vcmp.lt.s32.totalorder %v2548_v31, 0 }
  0xd4   :  { %v274_v22 = vsel %vm189_vm7, %v273_v53, %v2652_v41  ;;  %v2006_v6 = vadd.s32 4294967294, %v358_v1  ;;  %v170_v60 = vsub.s32 4, %v2727_v19  ;;  %v448_v24 = vmul.u32 %v441_v55, %v432_v38 }
  0xd5   :  { %v167_v18 = vmul.f32 %v166_v23, %v164_v49  ;;  %v451_v26 = vadd.s32 1, %v2837_v58  ;;  %v2859_v25 = vrot.slane %v2518_v14, %v2830_v52  ;;  %v346_v47 = vadd.s32 %v2748_v30, %v2759_v40 }
  0xd6   :  { %vm2007_vm1 = vcmp.lt.s32.totalorder %v2006_v6, 0  ;;  %vm450_vm2 = vc.u32 %v2843_v13, %v2836_v63  ;;  %v276_v12 = vsel %vm2766_vm8, 0, %v274_v22  ;;  %vm598_vm3 = vcmask 130048  }
  0xd7   :  { %v168_v4 = vxor.u32 2147483648, %v167_v18  ;;  %v2409_v10 = vpop.eup %2408  ;;  %v361_v0 = vsel %vm2007_vm1, 0, %v2006_v6  ;;  %v452_v21 = vsel %vm450_vm2, %v451_v26, %v2837_v58  ;;  %v171_v2 = vsel %vm86_vm15, %v170_v60, %v2727_v19  ;;  %2162 = vmatprep.mubr.msk.f32.mxu1 %vm598_vm3, %v2883_v36  ;;  %v2909_v58 = vld [vmem:[%s3207_s0 + $0x60] sm:$0xff] }
  0xd8   :  { %v362_v30 = vsub.s32 32, %v361_v0  ;;  %v363_v40 = vshll.u32 %v2813_v11, %v361_v0  ;;  %v366_v61 = vsub.s32 4294967266, %v361_v0  ;;  %v453_v45 = vadd.s32 %v452_v21, %v448_v24 }
  0xd9   :  { %v169_v41 = vsel %vm86_vm15, %v168_v4, %v167_v18  ;;  %v280_v57 = vand.u32 3, %v276_v12  ;;  %v173_v15 = vsel %vm2847_vm14, 0, %v171_v2  ;;  %v286_v50 = vxor.u32 2147483648, %v2409_v10 }
  0xda   :  { %v172_v14 = vsel %vm2847_vm14, %v2548_v31, %v169_v41  ;;  %v2411_v28 = vpop.eup %2410  ;;  %v364_v62 = vshrl.u32 %v346_v47, %v362_v30  ;;  %v367_v19 = vadd.s32 127, %v366_v61  ;;  %v454_v39 = vadd.s32 536870912, %v453_v45 }
  0xdb   :  { %2412 = vcosq.f32 %v172_v14  ;;  %vm282_vm4 = vcmp.eq.s32.totalorder %v280_v57, 0  ;;  %v283_v17 = vxor.u32 2147483648, %v2411_v28  ;;  %vm285_vm5 = vcmp.eq.s32.totalorder %v280_v57, 2 }
  0xdc   :  { %2414 = vsinq.f32 %v172_v14  ;;  %v365_v42 = vor.u32 %v364_v62, %v363_v40  ;;  %v368_v48 = vshll.u32 %v367_v19, 23  ;;  %v2896_v7 = vshrl.u32 %v454_v39, 30 }
  0xdd   :  { %v177_v23 = vand.u32 3, %v173_v15  ;;  %vm279_vm6 = vweird.f32 %v2550_v32  ;;  %vm281_vm7 = vcmp.lt.s32.totalorder %v280_v57, 2  ;;  %v284_v1 = vsel %vm282_vm4, %v2409_v10, %v283_v17 }
  0xde   :  { %v369_v51 = vor.u32 4788187, %v368_v48  ;;  %v372_v55 = vcvt.s32.f32 %v365_v42  ;;  %v456_v53 = vshll.u32 %v2896_v7, 30  ;;  %v287_v38 = vsel %vm285_vm5, %v286_v50, %v2411_v28 }
  0xdf   :  { %v2157_v27 = vpop.f32.mrb[0].mxu1  ;;  %vm292_vm8 = vcmp.lt.s32.totalorder %v2552_v33, 0  ;;  %vm182_vm9 = vcmp.eq.s32.totalorder %v177_v23, 2  ;;  %vm2916_vm10 = vcmp.le.f32.partialorder %v290_v43, 0.7853982  ;;  %vm178_vm11 = vcmp.lt.s32.totalorder %v177_v23, 2 }
  0xe0   :  { %v2878_v29 = vadd.f32 %v2157_v27, %v2859_v25  ;;  %v780_v34 = vpop.f32.mrb[1].mxu1  ;;  %v370_v49 = vand.u32 2147483647, %v369_v51  ;;  %v457_v56 = vsub.s32 %v453_v45, %v456_v53  ;;  %vm179_vm12 = vcmp.eq.s32.totalorder %v177_v23, 0  ;;  %v2928_v43 = vld [vmem:[%s3207_s0 + $0x68] sm:$0xff] }
  0xe1   :  { %v2886_v11 = vadd.f32 %v780_v34, %v2859_v25  ;;  %v376_v60 = vsub.s32 4, %v2798_v20  ;;  %v288_v26 = vsel %vm281_vm7, %v284_v1, %v287_v38  ;;  %vm176_vm13 = vweird.f32 %v2548_v31 }
  0xe2   :  { %v373_v59 = vmul.f32 %v372_v55, %v370_v49  ;;  %v459_v22 = vsub.s32 0, %v457_v56  ;;  %v289_v30 = vsel %vm279_vm6, nan, %v288_v26  ;;  %v449_v32 = vadd.s32 %v2836_v63, %v2843_v13 }
  0xe3   :  { %v2378_v44 = vpack.i.bf16 %v2878_v29, %v2886_v11  ;;  %v2284_v46 = vpack.c.bf16 %v2878_v29, %v2886_v11  ;;  %v377_v27 = vsel %vm292_vm8, %v376_v60, %v2798_v20  ;;  %vm382_vm4 = vweird.f32 %v2552_v33 }
  0xe4   :  { %v374_v47 = vxor.u32 2147483648, %v373_v59  ;;  %v2009_v10 = vmin.u32 %v459_v22, %v457_v56  ;;  %v379_v61 = vsel %vm2916_vm10, 0, %v377_v27  ;;  %vm395_vm5 = vcmp.lt.s32.totalorder %v2554_v35, 0 }
  0xe5   :  { %2379 = vrot.lane.b32.xlu1 %v2378_v44, %s2454_s5  ;;  %2285 = vmatprep.subr.bf16.mxu1 %v2284_v46  ;;  %v2413_v3 = vpop.eup %2412  ;;  %v383_v62 = vand.u32 3, %v379_v61  ;;  %vm394_vm6 = vcmp.le.f32.partialorder %v393_v54, 0.7853982 }
  0xe6   :  { %2287 = vmatpush3.bf16.msra.mxu1 %v2284_v46  ;;  %v2415_v6 = vpop.eup %2414  ;;  %v183_v4 = vxor.u32 2147483648, %v2413_v3  ;;  %v375_v0 = vsel %vm292_vm8, %v374_v47, %v373_v59  ;;  %v461_v21 = vclz %v2009_v10 }
  0xe7   :  { %v180_v24 = vxor.u32 2147483648, %v2415_v6  ;;  %v378_v40 = vsel %vm2916_vm10, %v2552_v33, %v375_v0  ;;  %vm388_vm15 = vcmp.eq.s32.totalorder %v383_v62, 2  ;;  %vm385_vm1 = vcmp.eq.s32.totalorder %v383_v62, 0  ;;  %v2977_v0 = vld [vmem:[%s3207_s0 + $0x40] sm:$0xff] }
  0xe8   :  { %v184_v41 = vsel %vm182_vm9, %v183_v4, %v2415_v6  ;;  %2416 = vcosq.f32 %v378_v40  ;;  %v2010_v2 = vadd.s32 4294967294, %v461_v21  ;;  %vm384_vm2 = vcmp.lt.s32.totalorder %v383_v62, 2  ;;  %v2987_v21 = vld [vmem:[%s3207_s0 + $0x48] sm:$0xff] }
  0xe9   :  { %2163 = vmatmul.mubr.msk.f32.vlgmr.msra.gmra.mrb[2].mxu1 %vm598_vm3, %v2903_v37  ;;  %v181_v12 = vsel %vm179_vm12, %v2413_v3, %v180_v24  ;;  %2418 = vsinq.f32 %v378_v40  ;;  %vm485_vm10 = vweird.f32 %v2554_v35 }
  0xea   :  { %2165 = vmatprep.mubr.msk.f32.mxu1 %vm598_vm3, %v2909_v58  ;;  %v185_v14 = vsel %vm178_vm11, %v181_v12, %v184_v41  ;;  %vm2011_vm14 = vcmp.lt.s32.totalorder %v2010_v2, 0 }
  0xeb   :  { %v186_v31 = vsel %vm176_vm13, nan, %v185_v14  ;;  %v464_v45 = vsel %vm2011_vm14, 0, %v2010_v2  ;;  %vm2463_vm13 = vmmov 0   ;;  %vm1989_vm14 = vcmask 785408  }
  0xec   :  { %2141 = vmatprep.mubr.msk.f32.mxu0 %vm598_vm3, %v186_v31  ;;  %v465_v28 = vsub.s32 32, %v464_v45  ;;  %v466_v34 = vshll.u32 %v457_v56, %v464_v45  ;;  %v469_v57 = vsub.s32 4294967266, %v464_v45  ;;  %v479_v56 = vsub.s32 4, %v2896_v7  ;;  %v697_v45 = vpop.permute.xlu0 %696 }
  0xed   :  { %2166 = vmatmul.mubr.msk.f32.gmra.mrb[4].mxu1 %vm598_vm3, %v2928_v43  ;;  %2142 = vmatmul.mubr.msk.f32.vlgmr.msra.gmra.mrb[0].mxu0 %vm598_vm3, %v289_v30 }
  0xee   :  { %v467_v20 = vshrl.u32 %v449_v32, %v465_v28  ;;  %v470_v19 = vadd.s32 127, %v469_v57  ;;  %v480_v33 = vsel %vm395_vm5, %v479_v56, %v2896_v7  ;;  %v2964_v7 = vld [vmem:[%s3207_s0 + $0x30] sm:$0xff] }
  0xef   :  { %v482_v3 = vsel %vm394_vm6, 0, %v480_v33 }
  0xf0   :  { %v468_v39 = vor.u32 %v467_v20, %v466_v34  ;;  %v471_v15 = vshll.u32 %v470_v19, 23  ;;  %v486_v18 = vand.u32 3, %v482_v3 }
  0xf2   :  { %v2417_v42 = vpop.eup %2416  ;;  %v472_v44 = vor.u32 4788187, %v471_v15  ;;  %v475_v46 = vcvt.s32.f32 %v468_v39  ;;  %vm491_vm7 = vcmp.eq.s32.totalorder %v486_v18, 2  ;;  %vm488_vm8 = vcmp.eq.s32.totalorder %v486_v18, 0 }
  0xf3   :  { %v2419_v48 = vpop.eup %2418  ;;  %v389_v63 = vxor.u32 2147483648, %v2417_v42  ;;  %vm487_vm9 = vcmp.lt.s32.totalorder %v486_v18, 2  ;;  %v3016_v18 = vld [vmem:[%s3207_s0 + $0x70] sm:$0xff] }
  0xf4   :  { %v386_v13 = vxor.u32 2147483648, %v2419_v48  ;;  %v473_v17 = vand.u32 2147483647, %v472_v44  ;;  %vm43_vm11 = vcmp.gt.f32.partialorder %v3016_v18, 0.0 }
  0xf5   :  { %v390_v50 = vsel %vm388_vm15, %v389_v63, %v2419_v48 }
  0xf6   :  { %v387_v23 = vsel %vm385_vm1, %v2417_v42, %v386_v13  ;;  %v476_v51 = vmul.f32 %v475_v46, %v473_v17 }
  0xf7   :  { %v391_v55 = vsel %vm384_vm2, %v387_v23, %v390_v50 }
  0xf8   :  { %v392_v53 = vsel %vm382_vm4, nan, %v391_v55  ;;  %v477_v49 = vxor.u32 2147483648, %v476_v51 }
  0xf9   :  { %2144 = vmatprep.mubr.msk.f32.mxu0 %vm598_vm3, %v392_v53 }
  0xfa   :  { %v478_v1 = vsel %vm395_vm5, %v477_v49, %v476_v51 }
  0xfb   :  { %v481_v38 = vsel %vm394_vm6, %v2554_v35, %v478_v1  ;;  %v2972_v35 = vld [vmem:[%s3207_s0 + $0x38] sm:$0xff] }
  0xfc   :  { %2420 = vcosq.f32 %v481_v38 }
  0xfd   :  { %2422 = vsinq.f32 %v481_v38 }
 0x106   :  { %v2421_v59 = vpop.eup %2420 }
 0x107   :  { %v2423_v22 = vpop.eup %2422  ;;  %v492_v6 = vxor.u32 2147483648, %v2421_v59 }
 0x108   :  { %v489_v54 = vxor.u32 2147483648, %v2423_v22 }
 0x109   :  { %v493_v4 = vsel %vm491_vm7, %v492_v6, %v2423_v22 }
 0x10a   :  { %v490_v60 = vsel %vm488_vm8, %v2421_v59, %v489_v54  ;;  %v3021_v59 = vld [vmem:[%s3207_s0 + $0x78] sm:$0xff] }
 0x10b   :  { %v494_v24 = vsel %vm487_vm9, %v490_v60, %v493_v4  ;;  %vm44_vm12 = vcmp.gt.f32.partialorder %v3021_v59, 0.0 }
 0x10c   :  { %v495_v26 = vsel %vm485_vm10, nan, %v494_v24 }
 0x10d   :  { %2145 = vmatmul.mubr.msk.f32.gmra.mrb[2].mxu0 %vm598_vm3, %v495_v26 }
 0x10e   :  { %2172 = vmatprep.mubr.msk.f32.mxu0 %vm598_vm3, %v2964_v7 }
 0x157   :  { %v2380_v47 = vpop.permute.xlu1 %2379 }
 0x158   :  { %v2382_v10 = vunpack.i.h.bf16 %v2380_v47  ;;  %v2381_v41 = vunpack.i.l.bf16 %v2380_v47 }
 0x15a   :  { %v2288_v12 = vpack.c.bf16 %v2382_v10, %v2381_v41 }
 0x15c   :  { %2289 = vmatprep.subr.bf16.mxu0 %v2288_v12 }
 0x15d   :  { %2291 = vmatpush3.bf16.msra.mxu0 %v2288_v12 }
 0x15e   :  { %2301 = vmatprep.subr.bf16.mxu0 %v2490_v5 }
 0x160   :  { %2173 = vmatmul.mubr.msk.f32.vlgmr.msra.gmra.mrb[4].mxu0 %vm598_vm3, %v2972_v35 }
 0x161   :  { %2175 = vmatprep.mubr.msk.f32.mxu0 %vm598_vm3, %v2977_v0  ;;  %2303 = vmatpush3.bf16.msra.mxu0 %v2490_v5 }
 0x162   :  { %2305 = vmatprep.subr.bf16.mxu0 %v2500_v9 }
 0x164   :  { %2176 = vmatmul.mubr.msk.f32.gmra.mrb[6].mxu0 %vm598_vm3, %v2987_v21 }
 0x165   :  { %2307 = vmatpush3.bf16.msra.mxu0 %v2500_v9 }
 0x1bc   :  { %v2164_v14 = vpop.f32.mrb[2].mxu1 }
 0x1bd   :  { %v867_v30 = vpop.f32.mrb[3].mxu1 }
 0x1c0   :  { %v2167_v40 = vpop.f32.mrb[4].mxu1  ;;  %v2143_v27 = vpop.f32.mrb[0].mxu0 }
 0x1c1   :  { %v877_v31 = vpop.f32.mrb[5].mxu1  ;;  %v677_v2 = vpop.f32.mrb[1].mxu0  ;;  %v2994_v28 = vadd.f32 %v2143_v27, %v697_v45 }
 0x1c2   :  { %v2996_v34 = vadd.f32 %v697_v45, %v677_v2 }
 0x1e0   :  { %v2146_v32 = vpop.f32.mrb[2].mxu0 }
 0x1e1   :  { %v687_v61 = vpop.f32.mrb[3].mxu0  ;;  %v3000_v9 = vadd.f32 %v2146_v32, %v697_v45 }
 0x1e2   :  { %v3002_v39 = vadd.f32 %v697_v45, %v687_v61 }
 0x233   :  { %v2174_v5 = vpop.f32.mrb[4].mxu0 }
 0x234   :  { %v992_v57 = vadd.f32 %v2174_v5, %v2994_v28  ;;  %v972_v62 = vpop.f32.mrb[5].mxu0 }
 0x235   :  { %v991_v20 = vadd.f32 %v972_v62, %v2996_v34 }
 0x236   :  { %v996_v19 = vmul.f32 %v2164_v14, %v992_v57 }
 0x237   :  { %v995_v15 = vmul.f32 %v991_v20, %v867_v30  ;;  %v3004_v42 = vpop.f32.mrb[6].mxu0 }
 0x238   :  { %v994_v44 = vadd.f32 %v3004_v42, %v3000_v9  ;;  %v982_v46 = vpop.f32.mrb[7].mxu0  ;;  %v1002_v48 = vsel %vm707_vm0, %v996_v19, 0.0 }
 0x239   :  { %v993_v63 = vadd.f32 %v982_v46, %v3002_v39  ;;  %1003 = vadd.xlane.f32.xlu0 %v1002_v48  ;;  %v999_v13 = vsel %vm707_vm0, %v995_v15, 0.0 }
 0x23a   :  { %v998_v17 = vmul.f32 %v2167_v40, %v994_v44  ;;  %1000 = vadd.xlane.f32.xlu1 %v999_v13 }
 0x23b   :  { %v997_v50 = vmul.f32 %v993_v63, %v877_v31 }
 0x23c   :  { %v1008_v23 = vsel %vm707_vm0, %v998_v17, 0.0 }
 0x23d   :  { %v1005_v51 = vsel %vm707_vm0, %v997_v50, 0.0 }
 0x23e   :  { %1009 = vadd.xlane.f32.xlu1 %v1008_v23  ;;  %1006 = vadd.xlane.f32.xlu0 %v1005_v51 }
 0x2c6   :  { %v1004_v55 = vpop.xlane.xlu0 %1003 }
 0x2c7   :  { %v1001_v53 = vpop.xlane.xlu1 %1000  ;;  %v1012_v56 = vmul.f32 0.17677669, %v1004_v55 }
 0x2c8   :  { %v1011_v49 = vmul.f32 0.17677669, %v1001_v53 }
 0x2ca   :  { %1015 = vxpose.xlu0.b32.start [1/4] (short) (narrow) %v1011_v49, 8 }
 0x2cb   :  { %v1007_v1 = vpop.xlane.xlu0 %1006  ;;  %v1010_v33 = vpop.xlane.xlu1 %1009 }
 0x2cc   :  { %v1013_v38 = vmul.f32 0.17677669, %v1007_v1  ;;  %v1014_v3 = vmul.f32 0.17677669, %v1010_v33 }
 0x2ce   :  { %1016 = vxpose.xlu0.b32.cont [2/4] (short) (narrow) %v1012_v56, 8 }
 0x2d2   :  { %1017 = vxpose.xlu0.b32.cont [3/4] (short) (narrow) %v1013_v38, 8 }
 0x2d6   :  { %1018 = vxpose.xlu0.b32.end [4/4] (short) (narrow) %v1014_v3, 8 }
 0x34a   :  { %v1031_v22 = vpop.trf.xlu0 }
 0x34b   :  { %v1050_v6 = vrot.slane %v1031_v22, %v2830_v52 }
 0x34d   :  { %v1051_v54 = vsel %vm43_vm11, %v1050_v6, -1e+30  ;;  %v1052_v60 = vsel %vm44_vm12, %v1050_v6, -1e+30 }
 0x34e   :  { %v1053_v4 = vsel %vm707_vm0, %v1051_v54, -inf  ;;  %v1056_v24 = vsel %vm707_vm0, %v1052_v60, -inf }
 0x34f   :  { %1054 = vmax.xlane.f32.xlu1 %v1053_v4 }
 0x353   :  { %1057 = vmax.xlane.f32.xlu1 %v1056_v24 }
 0x364   :  { %1083 = vrot.lane.b32.xlu1 %v2996_v34, %s2461_s4 }
 0x368   :  { %1085 = vrot.lane.b32.xlu1 %v2994_v28, %s2461_s4 }
 0x36c   :  { %1087 = vrot.lane.b32.xlu1 %v3002_v39, %s2461_s4 }
 0x370   :  { %1089 = vrot.lane.b32.xlu1 %v3000_v9, %s2461_s4 }
 0x3dc   :  { %v1055_v26 = vpop.xlane.xlu1 %1054 }
 0x3dd   :  { %v1059_v47 = vsub.f32 %v1051_v54, %v1055_v26 }
 0x3df   :  { %v1061_v10 = vmul.f32 1.442695, %v1059_v47 }
 0x3e0   :  { %v1058_v41 = vpop.xlane.xlu1 %1057 }
 0x3e1   :  { %2424 = vpow2.f32 %v1061_v10  ;;  %v1060_v12 = vsub.f32 %v1052_v60, %v1058_v41 }
 0x3e3   :  { %v1063_v14 = vmul.f32 1.442695, %v1060_v12  ;;  %v2448_v12 = vld [vmem:[%s3207_s0] sm:$0xff] }
 0x3e4   :  { %v3040_v30 = vpop.permute.xlu1 %1083 }
 0x3e5   :  { %2426 = vpow2.f32 %v1063_v14  ;;  %v1095_v31 = vadd.f32 %v3040_v30, %v972_v62 }
 0x3e8   :  { %v3042_v40 = vpop.permute.xlu1 %1085 }
 0x3e9   :  { %v1096_v27 = vadd.f32 %v2174_v5, %v3042_v40 }
 0x3eb   :  { %v2425_v2 = vpop.eup %2424  ;;  %v2383_v32 = vpack.i.bf16 %v1096_v27, %v1095_v31 }
 0x3ec   :  { %v3046_v61 = vpop.permute.xlu1 %1087  ;;  %v1065_v45 = vsel %vm43_vm11, %v2425_v2, 0.0 }
 0x3ed   :  { %v1067_v57 = vsel %vm707_vm0, %v1065_v45, 0.0  ;;  %v1097_v62 = vadd.f32 %v3046_v61, %v982_v46 }
 0x3ee   :  { %1068 = vadd.xlane.f32.xlu1 %v1067_v57 }
 0x3ef   :  { %v2427_v20 = vpop.eup %2426 }
 0x3f0   :  { %v3051_v19 = vpop.permute.xlu1 %1089  ;;  %v1066_v15 = vsel %vm44_vm12, %v2427_v20, 0.0 }
 0x3f1   :  { %v1098_v5 = vadd.f32 %v3004_v42, %v3051_v19  ;;  %v1070_v44 = vsel %vm707_vm0, %v1066_v15, 0.0 }
 0x3f2   :  { %1071 = vadd.xlane.f32.xlu0 %v1070_v44 }
 0x3f3   :  { %v2388_v48 = vpack.i.bf16 %v1098_v5, %v1097_v62 }
 0x3ff   :  { %2384 = vrot.lane.b32.xlu1 %v2383_v32, %s2454_s5 }
 0x403   :  { %2389 = vrot.lane.b32.xlu1 %v2388_v48, %s2454_s5 }
 0x47b   :  { %v1069_v63 = vpop.xlane.xlu1 %1068 }
 0x47c   :  { %v1073_v13 = vmax.f32 %v1069_v63, 1e-16 }
 0x47e   :  { %2428 = vrcp.f32 %v1073_v13 }
 0x47f   :  { %v1072_v17 = vpop.xlane.xlu0 %1071  ;;  %v2385_v50 = vpop.permute.xlu1 %2384 }
 0x480   :  { %v1074_v23 = vmax.f32 %v1072_v17, 1e-16  ;;  %v2387_v51 = vunpack.i.h.bf16 %v2385_v50  ;;  %v2386_v55 = vunpack.i.l.bf16 %v2385_v50 }
 0x482   :  { %2430 = vrcp.f32 %v1074_v23  ;;  %v2292_v46 = vpack.c.bf16 %v2387_v51, %v2386_v55 }
 0x483   :  { %v2390_v53 = vpop.permute.xlu1 %2389 }
 0x484   :  { %v2392_v42 = vunpack.i.h.bf16 %v2390_v53  ;;  %v2391_v49 = vunpack.i.l.bf16 %v2390_v53  ;;  %2293 = vmatprep.subr.bf16.mxu1 %v2292_v46 }
 0x485   :  { %2295 = vmatpush3.bf16.msra.mxu1 %v2292_v46 }
 0x486   :  { %v2296_v56 = vpack.c.bf16 %v2392_v42, %v2391_v49 }
 0x488   :  { %v2429_v1 = vpop.eup %2428  ;;  %2297 = vmatprep.subr.bf16.mxu1 %v2296_v56 }
 0x489   :  { %2299 = vmatpush3.bf16.msra.mxu1 %v2296_v56  ;;  %v1076_v38 = vmul.f32 %v2429_v1, %v1065_v45 }
 0x48b   :  { %2186 = vmatprep.mubr.msk.f32.mxu1 %vm707_vm0, %v1076_v38 }
 0x48c   :  { %v2431_v33 = vpop.eup %2430 }
 0x48d   :  { %v1078_v3 = vmul.f32 %v2431_v33, %v1066_v15 }
 0x48f   :  { %2187 = vmatmul.mubr.msk.f32.vlgmr.msra.gmra.mrb[6].mxu1 %vm707_vm0, %v1078_v3 }
 0x490   :  { %2204 = vmatprep.mubr.msk.f32.mxu1 %vm598_vm3, %v2883_v36 }
 0x562   :  { %v2188_v22 = vpop.f32.mrb[6].mxu1 }
 0x563   :  { %v1187_v6 = vpop.f32.mrb[7].mxu1 }
 0x564   :  { %1198 = vrot.lane.b32.xlu1 %v1187_v6, %s2454_s5 }
 0x568   :  { %1200 = vrot.lane.b32.xlu1 %v2188_v22, %s2454_s5 }
 0x5d6   :  { %v1199_v54 = vpop.permute.xlu1 %1198 }
 0x5d7   :  { %v1204_v4 = vadd.f32 %v1199_v54, %v2886_v11  ;;  %v2449_v11 = vld [vmem:[%s3207_s0 + $0x8] sm:$0xff] }
 0x5d9   :  { %2432 = vtanh.f32 %v1204_v4 }
 0x5da   :  { %v1201_v60 = vpop.permute.xlu1 %1200 }
 0x5db   :  { %v1205_v24 = vadd.f32 %v1201_v60, %v2878_v29 }
 0x5dd   :  { %2434 = vtanh.f32 %v1205_v24 }
 0x5e3   :  { %v2433_v26 = vpop.eup %2432 }
 0x5e4   :  { %v1208_v47 = vmul.f32 0.1, %v2433_v26 }
 0x5e6   :  { %1212 = vrot.lane.b32.xlu0 %v1208_v47, %s2461_s4 }
 0x5e7   :  { %v2435_v10 = vpop.eup %2434 }
 0x5e8   :  { %v1209_v36 = vmul.f32 0.1, %v2435_v10 }
 0x5ea   :  { %1214 = vrot.lane.b32.xlu1 %v1209_v36, %s2461_s4 }
 0x658   :  { %v1213_v41 = vpop.permute.xlu0 %1212 }
 0x659   :  { %v3074_v14 = vadd.f32 %v2448_v12, %v1213_v41 }
 0x65b   :  { %2197 = vmatprep.mubr.msk.f32.mxu0 %vm707_vm0, %v3074_v14 }
 0x65c   :  { %v1215_v29 = vpop.permute.xlu1 %1214 }
 0x65d   :  { %v3081_v31 = vadd.f32 %v2449_v11, %v1215_v29 }
 0x65f   :  { %2198 = vmatmul.mubr.msk.f32.vlgmr.msra.gmra.mrb[8].mxu0 %vm707_vm0, %v3081_v31 }
 0x660   :  { %2214 = vmatprep.mubr.msk.f32.mxu0 %vm598_vm3, %v2964_v7 }
 0x732   :  { %v2199_v27 = vpop.f32.mrb[8].mxu0 }
 0x733   :  { %v3088_v2 = vadd.f32 %v2199_v27, %v2859_v25  ;;  %v1292_v32 = vpop.f32.mrb[9].mxu0 }
 0x734   :  { %v3091_v45 = vadd.f32 %v1292_v32, %v2859_v25 }
 0x736   :  { %v2393_v57 = vpack.i.bf16 %v3088_v2, %v3091_v45  ;;  %v2308_v20 = vpack.c.bf16 %v3088_v2, %v3091_v45 }
 0x738   :  { %2394 = vrot.lane.b32.xlu1 %v2393_v57, %s2454_s5  ;;  %2309 = vmatprep.subr.bf16.mxu1 %v2308_v20 }
 0x739   :  { %2311 = vmatpush3.bf16.msra.mxu1 %v2308_v20 }
 0x73c   :  { %2205 = vmatmul.mubr.msk.f32.vlgmr.msra.gmra.mrb[8].mxu1 %vm598_vm3, %v2903_v37 }
 0x73d   :  { %2207 = vmatprep.mubr.msk.f32.mxu1 %vm598_vm3, %v2909_v58 }
 0x740   :  { %2208 = vmatmul.mubr.msk.f32.gmra.mrb[10].mxu1 %vm598_vm3, %v2928_v43 }
 0x7aa   :  { %v2395_v25 = vpop.permute.xlu1 %2394 }
 0x7ab   :  { %v2397_v7 = vunpack.i.h.bf16 %v2395_v25  ;;  %v2396_v15 = vunpack.i.l.bf16 %v2395_v25 }
 0x7ad   :  { %v2312_v62 = vpack.c.bf16 %v2397_v7, %v2396_v15 }
 0x7af   :  { %2313 = vmatprep.subr.bf16.mxu0 %v2312_v62 }
 0x7b0   :  { %2315 = vmatpush3.bf16.msra.mxu0 %v2312_v62 }
 0x7b3   :  { %2215 = vmatmul.mubr.msk.f32.vlgmr.msra.gmra.mrb[10].mxu0 %vm598_vm3, %v2972_v35 }
 0x7b4   :  { %2217 = vmatprep.mubr.msk.f32.mxu0 %vm598_vm3, %v2977_v0 }
 0x7b7   :  { %2218 = vmatmul.mubr.msk.f32.gmra.mrb[12].mxu0 %vm598_vm3, %v2987_v21 }
 0x80f   :  { %v2206_v37 = vpop.f32.mrb[8].mxu1 }
 0x810   :  { %v1367_v58 = vpop.f32.mrb[9].mxu1 }
 0x813   :  { %v2209_v5 = vpop.f32.mrb[10].mxu1 }
 0x814   :  { %v1377_v44 = vpop.f32.mrb[11].mxu1 }
 0x886   :  { %v2216_v43 = vpop.f32.mrb[10].mxu0 }
 0x887   :  { %v1480_v48 = vadd.f32 %v2216_v43, %v2994_v28  ;;  %v1568_v63 = vadd.f32 %v2216_v43, %v3042_v40  ;;  %v1460_v13 = vpop.f32.mrb[11].mxu0 }
 0x888   :  { %v1567_v17 = vadd.f32 %v1460_v13, %v3040_v30  ;;  %v1479_v35 = vadd.f32 %v1460_v13, %v2996_v34 }
 0x889   :  { %v1484_v50 = vmul.f32 %v2206_v37, %v1480_v48 }
 0x88a   :  { %v2398_v23 = vpack.i.bf16 %v1568_v63, %v1567_v17  ;;  %v1483_v0 = vmul.f32 %v1479_v35, %v1367_v58  ;;  %v2219_v51 = vpop.f32.mrb[12].mxu0 }
 0x88b   :  { %v1482_v21 = vadd.f32 %v2219_v51, %v3000_v9  ;;  %v1570_v55 = vadd.f32 %v2219_v51, %v3051_v19  ;;  %v1470_v46 = vpop.f32.mrb[13].mxu0  ;;  %v1490_v53 = vsel %vm707_vm0, %v1484_v50, 0.0 }
 0x88c   :  { %v1569_v28 = vadd.f32 %v1470_v46, %v3046_v61  ;;  %v1481_v40 = vadd.f32 %v1470_v46, %v3002_v39  ;;  %1491 = vadd.xlane.f32.xlu0 %v1490_v53  ;;  %v1487_v30 = vsel %vm707_vm0, %v1483_v0, 0.0  ;;  %v2462_v46 = vmov 0.0|0.0  }
 0x88d   :  { %v1486_v42 = vmul.f32 %v2209_v5, %v1482_v21  ;;  %1488 = vadd.xlane.f32.xlu1 %v1487_v30  ;;  %2327 = vmatprep.subr.bf16.mxu0 %v2462_v46  ;;  %v2464_v53 = vmov 0.0  }
 0x88e   :  { %v2403_v34 = vpack.i.bf16 %v1570_v55, %v1569_v28  ;;  %v1485_v49 = vmul.f32 %v1481_v40, %v1377_v44  ;;  %2252 = vmatprep.mubr.msk.f32.mxu0 %vm2463_vm13, %v2464_v53 }
 0x88f   :  { %v1496_v9 = vsel %vm707_vm0, %v1486_v42, 0.0  ;;  %v19_v42 = vld [vmem:[%s3206_s1 + $0x40] sm:$0xff] }
 0x890   :  { %v1493_v56 = vsel %vm707_vm0, %v1485_v49, 0.0 }
 0x891   :  { %1494 = vadd.xlane.f32.xlu1 %v1493_v56  ;;  %v21_v56 = vld [vmem:[%s3206_s1 + $0x50] sm:$0xff] }
 0x895   :  { %1497 = vadd.xlane.f32.xlu1 %v1496_v9 }
 0x919   :  { %v1492_v38 = vpop.xlane.xlu0 %1491 }
 0x91a   :  { %v1489_v19 = vpop.xlane.xlu1 %1488  ;;  %v1500_v33 = vmul.f32 0.17677669, %v1492_v38 }
 0x91b   :  { %v1499_v1 = vmul.f32 0.17677669, %v1489_v19 }
 0x91d   :  { %1503 = vxpose.xlu0.b32.start [1/4] (short) (narrow) %v1499_v1, 8 }
 0x91e   :  { %v1495_v61 = vpop.xlane.xlu1 %1494 }
 0x91f   :  { %v1501_v39 = vmul.f32 0.17677669, %v1495_v61 }
 0x921   :  { %1504 = vxpose.xlu0.b32.cont [2/4] (short) (narrow) %v1500_v33, 8 }
 0x922   :  { %v1498_v3 = vpop.xlane.xlu1 %1497 }
 0x923   :  { %v1502_v22 = vmul.f32 0.17677669, %v1498_v3  ;;  %v46_v3 = vld [vmem:[%s3207_s0 + $0x88] sm:$0xff] }
 0x925   :  { %1505 = vxpose.xlu0.b32.cont [3/4] (short) (narrow) %v1501_v39, 8  ;;  %v45_v39 = vld [vmem:[%s3207_s0 + $0x80] sm:$0xff] }
 0x929   :  { %1506 = vxpose.xlu0.b32.end [4/4] (short) (narrow) %v1502_v22, 8 }
 0x99d   :  { %v1519_v6 = vpop.trf.xlu0 }
 0x99e   :  { %v1538_v54 = vrot.slane %v1519_v6, %v2830_v52 }
 0x9a0   :  { %v1539_v4 = vsel %vm43_vm11, %v1538_v54, -1e+30  ;;  %v1540_v24 = vsel %vm44_vm12, %v1538_v54, -1e+30 }
 0x9a1   :  { %v1541_v60 = vsel %vm707_vm0, %v1539_v4, -inf  ;;  %v1544_v26 = vsel %vm707_vm0, %v1540_v24, -inf }
 0x9a2   :  { %1542 = vmax.xlane.f32.xlu1 %v1541_v60 }
 0x9a6   :  { %1545 = vmax.xlane.f32.xlu1 %v1544_v26 }
 0x9b7   :  { %2399 = vrot.lane.b32.xlu1 %v2398_v23, %s2454_s5 }
 0xa2f   :  { %v1543_v47 = vpop.xlane.xlu1 %1542 }
 0xa30   :  { %v1547_v10 = vsub.f32 %v1539_v4, %v1543_v47 }
 0xa32   :  { %v1549_v36 = vmul.f32 1.442695, %v1547_v10  ;;  %v24_v10 = vld [vmem:[%s3206_s1 + $0x68] sm:$0xff] }
 0xa33   :  { %v1546_v41 = vpop.xlane.xlu1 %1545 }
 0xa34   :  { %2436 = vpow2.f32 %v1549_v36  ;;  %v1548_v52 = vsub.f32 %v1540_v24, %v1546_v41  ;;  %v23_v24 = vld [vmem:[%s3206_s1 + $0x60] sm:$0xff]  ;;  %v25_v36 = vld [vmem:[%s3206_s1 + $0x70] sm:$0xff] }
 0xa36   :  { %v1551_v12 = vmul.f32 1.442695, %v1548_v52  ;;  %v2337_v52 = vpack.c.bf16 %v25_v36, %v24_v10 }
 0xa37   :  { %v2400_v29 = vpop.permute.xlu1 %2399 }
 0xa38   :  { %2438 = vpow2.f32 %v1551_v12  ;;  %v2402_v11 = vunpack.i.h.bf16 %v2400_v29  ;;  %v2401_v27 = vunpack.i.l.bf16 %v2400_v29 }
 0xa3a   :  { %v2316_v32 = vpack.c.bf16 %v2402_v11, %v2401_v27 }
 0xa3c   :  { %2317 = vmatprep.subr.bf16.mxu1 %v2316_v32 }
 0xa3d   :  { %2319 = vmatpush3.bf16.msra.mxu1 %v2316_v32 }
 0xa3e   :  { %v2437_v57 = vpop.eup %2436 }
 0xa3f   :  { %v1553_v20 = vsel %vm43_vm11, %v2437_v57, 0.0 }
 0xa40   :  { %v1555_v25 = vsel %vm707_vm0, %v1553_v20, 0.0 }
 0xa41   :  { %1556 = vadd.xlane.f32.xlu1 %v1555_v25 }
 0xa42   :  { %v2439_v7 = vpop.eup %2438 }
 0xa43   :  { %v1554_v15 = vsel %vm44_vm12, %v2439_v7, 0.0 }
 0xa44   :  { %v1558_v62 = vsel %vm707_vm0, %v1554_v15, 0.0 }
 0xa45   :  { %1559 = vadd.xlane.f32.xlu1 %v1558_v62 }
 0xa56   :  { %2404 = vrot.lane.b32.xlu1 %v2403_v34, %s2454_s5  ;;  %v20_v34 = vld [vmem:[%s3206_s1 + $0x48] sm:$0xff] }
 0xa57   :  { %v2331_v9 = vpack.c.bf16 %v21_v56, %v20_v34 }
 0xace   :  { %v1557_v37 = vpop.xlane.xlu1 %1556 }
 0xacf   :  { %v1561_v58 = vmax.f32 %v1557_v37, 1e-16 }
 0xad1   :  { %2440 = vrcp.f32 %v1561_v58 }
 0xad2   :  { %v1560_v5 = vpop.xlane.xlu1 %1559 }
 0xad3   :  { %v1562_v44 = vmax.f32 %v1560_v5, 1e-16 }
 0xad5   :  { %2442 = vrcp.f32 %v1562_v44  ;;  %v1890_v44 = vsub.s32 2, %v2498_v8 }
 0xad6   :  { %v2405_v18 = vpop.permute.xlu1 %2404 }
 0xad7   :  { %v2407_v43 = vunpack.i.h.bf16 %v2405_v18  ;;  %v2406_v48 = vunpack.i.l.bf16 %v2405_v18  ;;  %v2450_v18 = vld [vmem:[%s3206_s1 + $0x78] sm:$0xff] }
 0xad9   :  { %v2320_v63 = vpack.c.bf16 %v2407_v43, %v2406_v48  ;;  %v1891_v43 = vrot.slane %v2450_v18, %v1890_v44 }
 0xadb   :  { %v2441_v13 = vpop.eup %2440  ;;  %2321 = vmatprep.subr.bf16.mxu1 %v2320_v63 }
 0xadc   :  { %2323 = vmatpush3.bf16.msra.mxu1 %v2320_v63  ;;  %v1564_v59 = vmul.f32 %v2441_v13, %v1553_v20 }
 0xadd   :  { %2324 = vmatprep.subr.bf16.mxu1 %v2462_v46 }
 0xade   :  { %2228 = vmatprep.mubr.msk.f32.mxu1 %vm707_vm0, %v1564_v59 }
 0xadf   :  { %v2443_v17 = vpop.eup %2442 }
 0xae0   :  { %v1566_v35 = vmul.f32 %v2443_v17, %v1554_v15 }
 0xae2   :  { %2229 = vmatmul.mubr.msk.f32.vlgmr.msra.gmra.mrb[12].mxu1 %vm707_vm0, %v1566_v35 }
 0xae3   :  { %2235 = vmatprep.mubr.msk.f32.mxu1 %vm2463_vm13, %v2464_v53 }
 0xbb5   :  { %v2230_v50 = vpop.f32.mrb[12].mxu1 }
 0xbb6   :  { %v1659_v23 = vpop.f32.mrb[13].mxu1 }
 0xbb7   :  { %1670 = vrot.lane.b32.xlu1 %v1659_v23, %s2454_s5 }
 0xbbb   :  { %1672 = vrot.lane.b32.xlu1 %v2230_v50, %s2454_s5 }
 0xc29   :  { %v1671_v0 = vpop.permute.xlu1 %1670 }
 0xc2a   :  { %v1676_v51 = vadd.f32 %v1671_v0, %v3091_v45 }
 0xc2c   :  { %2444 = vtanh.f32 %v1676_v51 }
 0xc2d   :  { %v1673_v21 = vpop.permute.xlu1 %1672 }
 0xc2e   :  { %v1677_v55 = vadd.f32 %v1673_v21, %v3088_v2  ;;  %v18_v2 = vld [vmem:[%s3206_s1 + $0x38] sm:$0xff] }
 0xc2f   :  { %v2328_v49 = vpack.c.bf16 %v19_v42, %v18_v2 }
 0xc30   :  { %2446 = vtanh.f32 %v1677_v55 }
 0xc31   :  { %2329 = vmatpush3.bf16.msra.mxu0 %v2328_v49 }
 0xc32   :  { %2330 = vmatprep.subr.bf16.mxu0 %v2462_v46 }
 0xc35   :  { %2332 = vmatpush3.bf16.msra.mxu0 %v2331_v9 }
 0xc36   :  { %v2445_v28 = vpop.eup %2444 }
 0xc37   :  { %v1680_v40 = vmul.f32 0.1, %v2445_v28 }
 0xc39   :  { %1684 = vrot.lane.b32.xlu1 %v1680_v40, %s2461_s4 }
 0xc3a   :  { %v2447_v30 = vpop.eup %2446 }
 0xc3b   :  { %v1681_v45 = vmul.f32 0.1, %v2447_v30 }
 0xc3d   :  { %1686 = vrot.lane.b32.xlu1 %v1681_v45, %s2461_s4 }
 0xc41   :  { %1870 = vrot.lane.b32.xlu1 %v2525_v16, %s2465_s24  ;;  %v22_v16 = vld [vmem:[%s3206_s1 + $0x58] sm:$0xff] }
 0xc42   :  { %v2333_v26 = vpack.c.bf16 %v23_v24, %v22_v16 }
 0xcab   :  { %v1685_v19 = vpop.permute.xlu1 %1684 }
 0xcac   :  { %v1690_v38 = vadd.f32 %v1685_v19, %v3074_v14  ;;  %v47_v14 = vld [vmem:[%s3207_s0 + $0x90] sm:$0xff] }
 0xcaf   :  { %v1687_v1 = vpop.permute.xlu1 %1686 }
 0xcb0   :  { %v1691_v61 = vadd.f32 %v1687_v1, %v3081_v31 }
 0xcb2   :  { %v2325_v33 = vpack.c.bf16 %v1691_v61, %v1690_v38 }
 0xcb3   :  { %v1871_v29 = vpop.permute.xlu1 %1870 }
 0xcb4   :  { %2326 = vmatpush3.bf16.msra.mxu1 %v2325_v33 }
 0xcb5   :  { %2334 = vmatprep.subr.bf16.mxu1 %v2333_v26 }
 0xcb7   :  { %2236 = vmatmul.mubr.msk.f32.vlgmr.msra.gmra.mrb[14].mxu1 %vm598_vm3, %v45_v39 }
 0xcb8   :  { %2238 = vmatprep.mubr.msk.f32.mxu1 %vm2463_vm13, %v2464_v53  ;;  %2336 = vmatpush3.bf16.msra.mxu1 %v2333_v26 }
 0xcb9   :  { %2338 = vmatprep.subr.bf16.mxu1 %v2337_v52 }
 0xcbb   :  { %2239 = vmatmul.mubr.msk.f32.gmra.mrb[16].mxu1 %vm598_vm3, %v46_v3 }
 0xcbc   :  { %2241 = vmatprep.mubr.msk.f32.mxu1 %vm2463_vm13, %v2464_v53  ;;  %2340 = vmatpush3.bf16.msra.mxu1 %v2337_v52 }
 0xcbf   :  { %2242 = vmatmul.mubr.msk.f32.gmra.mrb[18].mxu1 %vm598_vm3, %v47_v14  ;;  %vm1987_vm3 = vcmask 523264  }
 0xd8a   :  { %v1767_v31 = vpop.f32.mrb[14].mxu1 }
 0xd8b   :  { %2253 = vmatmul.mubr.msk.f32.vlgmr.msra.gmra.mrb[14].mxu0 %vm707_vm0, %v1767_v31  ;;  %v2237_v22 = vpop.f32.mrb[15].mxu1 }
 0xd8c   :  { %2255 = vmatprep.mubr.msk.f32.mxu0 %vm2463_vm13, %v2464_v53 }
 0xd8e   :  { %v1772_v6 = vpop.f32.mrb[16].mxu1 }
 0xd8f   :  { %2256 = vmatmul.mubr.msk.f32.gmra.mrb[16].mxu0 %vm707_vm0, %v1772_v6  ;;  %v2240_v54 = vpop.f32.mrb[17].mxu1 }
 0xd90   :  { %2258 = vmatprep.mubr.msk.f32.mxu0 %vm2463_vm13, %v2464_v53 }
 0xd92   :  { %v1777_v4 = vpop.f32.mrb[18].mxu1 }
 0xd93   :  { %2259 = vmatmul.mubr.msk.f32.gmra.mrb[18].mxu0 %vm707_vm0, %v1777_v4  ;;  %v2243_v60 = vpop.f32.mrb[19].mxu1 }
 0xe5e   :  { %v1856_v47 = vpop.f32.mrb[14].mxu0 }
 0xe5f   :  { %v2254_v41 = vpop.f32.mrb[15].mxu0  ;;  %v1873_v25 = vadd.f32 %v1871_v29, %v1856_v47 }
 0xe62   :  { %v1861_v12 = vpop.f32.mrb[16].mxu0 }
 0xe63   :  { %v1874_v11 = vadd.f32 %v1871_v29, %v1861_v12  ;;  %v2257_v27 = vpop.f32.mrb[17].mxu0 }
 0xe65   :  { %1877 = vrot.lane.b32.xlu0 %v1874_v11, %s2454_s5 }
 0xe66   :  { %v1866_v32 = vpop.f32.mrb[18].mxu0 }
 0xe67   :  { %v1875_v57 = vadd.f32 %v1871_v29, %v1866_v32  ;;  %v2260_v20 = vpop.f32.mrb[19].mxu0 }
 0xe69   :  { %1882 = vrot.lane.b32.xlu1 %v1875_v57, %s2454_s5 }
 0xed7   :  { %v1878_v7 = vpop.permute.xlu0 %1877 }
 0xed8   :  { %v1880_v15 = vadd.f32 %v1878_v7, %v1873_v25 }
 0xeda   :  { %v1886_v62 = vmax.f32 %v1880_v15, 0.0 }
 0xedb   :  { %v1883_v37 = vpop.permute.xlu1 %1882 }
 0xedc   :  { %v1885_v58 = vadd.f32 %v1883_v37, %v1873_v25  ;;  %2269 = vmatprep.mubr.msk.f32.mxu1 %vm707_vm0, %v1886_v62 }
 0xede   :  { %v1887_v5 = vmax.f32 %v1885_v58, 0.0 }
 0xee0   :  { %2270 = vmatmul.mubr.msk.f32.vlgmr.msra.gmra.mrb[20].mxu1 %vm707_vm0, %v1887_v5 }
 0xfb3   :  { %v2271_v48 = vpop.f32.mrb[20].mxu1 }
 0xfb4   :  { %v1964_v63 = vpop.f32.mrb[21].mxu1  ;;  %v1970_v59 = vadd.f32 %v2271_v48, %v1891_v43 }
 0xfb5   :  { %v1965_v13 = vadd.f32 %v1964_v63, %v1891_v43 }
 0xfb7   :  { %1975 = vperm.xlu1 %2377, %v1965_v13  }
 0xfbb   :  { %1980 = vperm.xlu1 %2377, %v1970_v59  }
 0xfbf   :  { %1983 = vrot.lane.b32.xlu1 %v1772_v6, %s2461_s4 }
0x1036   :  { %v1976_v17 = vpop.permute.xlu1 %1975 }
0x103a   :  { %v1981_v35 = vpop.permute.xlu1 %1980 }
0x103e   :  { %v1984_v50 = vpop.permute.xlu1 %1983 }
0x103f   :  { %v1986_v8 = vsel %vm707_vm0, %v1767_v31, %v1984_v50 }
0x1040   :  { %v1988_v23 = vsel %vm1987_vm3, %v1986_v8, %v1976_v17 }
0x1041   :  { %v1990_v0 = vsel %vm1989_vm14, %v1988_v23, %v1981_v35 }
0x1042   :  { %1991 = vst [vmem:[%s3208_s2] sm:$0xff] %v1990_v0 }

</bundles_post_ra>
